<compile_context>
chip_gen: v6e
topology: v6e:2x2x1
jax: 0.10.0
libtpu: 0.0.40
codegen_flags: <defaults>
</compile_context>

<pallas_src>
import functools

import jax
import jax.numpy as jnp
from jax import lax
from jax.experimental import pallas as pl
from jax.experimental.pallas import tpu as pltpu


def double_conv_kernel(x_ref, w1_ref, b1_ref, w2_ref, b2_ref, masks_ref,
                       o_ref, *, W, nb, mxu_dtype):
    """Fused (conv3x3 -> BN -> ReLU) x2 for `nb` batch elements.

    x_ref:     (nb, Cin_p, H*W)    input, channels zero-padded
    w1_ref:    (Cmid_p, 9*Cin_p)   stage-1 weights, BN1 scale folded (bf16)
    b1_ref:    (Cmid_p, 1)         folded BN1 bias (f32)
    w2_ref:    (Cout_p, 9*Cmid_p)  stage-2 weights, BN2 scale folded (bf16)
    b2_ref:    (Cout_p, 1)         folded BN2 bias (f32)
    masks_ref: (9, nb*H*W)         0/1 border masks per tap k = ky*3 + kx
    o_ref:     (nb, Cout_p, H*W)   output (flat NCHW), lane-dense
    """
    HW = x_ref.shape[-1]
    nbHW = nb * HW
    masks = masks_ref[...]                       # (9, nb*HW) -- loaded once

    def im2col(v):
        # v: (C, nb*HW) -> (9*C, nb*HW) in the MXU operand dtype.
        # Row (ky*3+kx)*C + c holds v shifted by (ky-1, kx-1) with zeros
        # outside each image: lane roll (XLU slot) * precomputed 0/1 mask,
        # so no strided slice/reshape relayouts and no cross-image leakage.
        C = v.shape[0]
        taps = []
        for k in range(9):
            dy, dx = k // 3 - 1, k % 3 - 1
            off = dy * W + dx                    # flat lane shift
            if off == 0:
                t = v                            # center tap: no shift/mask
            else:
                t = pltpu.roll(v, shift=(-off) % nbHW, axis=1) * masks[k:k + 1]
            taps.append(t.astype(mxu_dtype)[None])          # (1, C, nb*HW)
        # Concat on the outer dim, then full-tile merge to (9*C, nb*HW).
        return jnp.concatenate(taps, axis=0).reshape(9 * C, nbHW)

    def conv_bn_relu(v, w_ref, b_ref):
        # (Cout_p, 9C) @ (9C, nb*HW) on the MXU, f32 accumulation.
        acc = jnp.dot(w_ref[...], im2col(v),
                      preferred_element_type=jnp.float32)
        return jnp.maximum(acc + b_ref[...], 0.0)            # f32

    # Widen the batch onto the lane axis: (nb, C, HW) -> (C, nb*HW)
    # (lane-axis concat at 128-lane multiples: cheap full-tile moves).
    x = jnp.concatenate([x_ref[n] for n in range(nb)], axis=-1)
    h = conv_bn_relu(x, w1_ref, b1_ref)          # intermediate stays on-chip
    y = conv_bn_relu(h, w2_ref, b2_ref)          # (Cout_p, nb*HW) f32
    for n in range(nb):                          # unmasked full-tile stores
        o_ref[n] = y[:, n * HW:(n + 1) * HW].astype(o_ref.dtype)


def _round_up(c, m):
    return (c + m - 1) // m * m


def _fold_bn(gamma, beta, mean, var, eps=1e-5):
    scale = gamma / jnp.sqrt(var + eps)
    return scale, beta - mean * scale


def _pack_weight(w, scale, cin_p, cout_p, dtype):
    """PyTorch (Cout, Cin, 3, 3) -> (cout_p, 9*cin_p) with per-output-channel
    BN scale folded in; column layout is (ky*3+kx)*cin_p + ci."""
    cout, cin = w.shape[0], w.shape[1]
    w = w * scale[:, None, None, None]
    w = jnp.pad(w, ((0, cout_p - cout), (0, cin_p - cin), (0, 0), (0, 0)))
    return jnp.transpose(w, (0, 2, 3, 1)).reshape(cout_p, 9 * cin_p).astype(dtype)


def _pad_channel_vec(v, c_p):
    return jnp.pad(v, (0, c_p - v.shape[0])).reshape(c_p, 1).astype(jnp.float32)


def _border_masks(H, W, reps):
    """(9, reps*H*W) 0/1 masks; tap k valid iff (y+ky-1, x+kx-1) is inside the
    image.  Tiled `reps` times to cover every batch element folded onto lanes."""
    yy, xx = jnp.meshgrid(jnp.arange(H), jnp.arange(W), indexing="ij")
    ms = []
    for k in range(9):
        dy, dx = k // 3 - 1, k % 3 - 1
        m = (yy + dy >= 0) & (yy + dy < H) & (xx + dx >= 0) & (xx + dx < W)
        ms.append(m.reshape(H * W))
    masks = jnp.stack(ms).astype(jnp.float32)          # (9, H*W)
    return jnp.tile(masks, (1, reps))                  # (9, reps*H*W)


def double_conv_pallas(x_nchw, params, *, mxu_dtype=jnp.bfloat16):
    """DoubleConv forward: NCHW in, NCHW out (matches the PyTorch module)."""
    N, Cin, H, W = x_nchw.shape
    Cmid = params["w1"].shape[0]
    Cout = params["w2"].shape[0]
    HW = H * W

    # Batch folding: nb elements per grid step, folded onto the lane axis.
    # Keep 2 "parallel" grid steps when the batch allows it (v7x: 2 TCs);
    # on v5e/v6e the split is harmless.
    nb = N // 2 if (N % 2 == 0 and N >= 4) else 1
    num_steps = N // nb

    # Cin/Cmid feed the (9,C,.)->(9C,.) tap reshape -> pad to the MXU-operand
    # sublane tile (16 for bf16, 8 for f32).  Cout only sets the output
    # sublane dim -> pad to 8 so the post-call slice is usually a no-op.
    in_mult = 16 if mxu_dtype == jnp.bfloat16 else 8
    Cin_p, Cmid_p = _round_up(Cin, in_mult), _round_up(Cmid, in_mult)
    Cout_p = _round_up(Cout, 8)

    # Flat NCHW input, channels zero-padded.
    x_flat = jnp.pad(x_nchw.reshape(N, Cin, HW),
                     ((0, 0), (0, Cin_p - Cin), (0, 0)))

    s1, b1 = _fold_bn(params["g1"], params["be1"], params["rm1"], params["rv1"])
    s2, b2 = _fold_bn(params["g2"], params["be2"], params["rm2"], params["rv2"])
    w1 = _pack_weight(params["w1"].astype(jnp.float32), s1, Cin_p, Cmid_p, mxu_dtype)
    w2 = _pack_weight(params["w2"].astype(jnp.float32), s2, Cmid_p, Cout_p, mxu_dtype)
    b1 = _pad_channel_vec(b1, Cmid_p)
    b2 = _pad_channel_vec(b2, Cout_p)
    masks = _border_masks(H, W, nb)

    kernel = functools.partial(double_conv_kernel, W=W, nb=nb, mxu_dtype=mxu_dtype)
    out_flat = pl.pallas_call(
        kernel,
        out_shape=jax.ShapeDtypeStruct((N, Cout_p, HW), x_nchw.dtype),
        grid=(num_steps,),
        in_specs=[
            pl.BlockSpec((nb, Cin_p, HW), lambda g: (g, 0, 0)),       # x
            pl.BlockSpec((Cmid_p, 9 * Cin_p), lambda g: (0, 0)),      # w1 (scale folded)
            pl.BlockSpec((Cmid_p, 1), lambda g: (0, 0)),              # b1
            pl.BlockSpec((Cout_p, 9 * Cmid_p), lambda g: (0, 0)),     # w2 (scale folded)
            pl.BlockSpec((Cout_p, 1), lambda g: (0, 0)),              # b2
            pl.BlockSpec((9, nb * HW), lambda g: (0, 0)),             # masks
        ],
        out_specs=pl.BlockSpec((nb, Cout_p, HW), lambda g: (g, 0, 0)),
        compiler_params=pltpu.CompilerParams(
            dimension_semantics=("parallel",)),
        # TODO(synk): set vmem_limit_bytes explicitly when the real-size
        #             HW-strip grid axis is added (v7x: 64 MiB physical).
    )(x_flat, w1, b1, w2, b2, masks)

    # (N, Cout_p, H*W) is flat NCHW already; skip the slice when un-padded
    # (keep the padded flat layout as the handoff format when chaining).
    out = out_flat if Cout_p == Cout else out_flat[:, :Cout]
    return out.reshape(N, Cout, H, W)


def double_conv_reference(x_nchw, params):
    """Pure-JAX f32 reference (lax conv, NCHW), eval-mode BN."""
    def block(x, w, g, be, rm, rv):
        y = lax.conv_general_dilated(
            x, w, window_strides=(1, 1), padding=((1, 1), (1, 1)),
            dimension_numbers=("NCHW", "OIHW", "NCHW"),
        )
        s, b = _fold_bn(g, be, rm, rv)
        y = y * s[None, :, None, None] + b[None, :, None, None]
        return jnp.maximum(y, 0.0)

    h = block(x_nchw, params["w1"], params["g1"], params["be1"],
              params["rm1"], params["rv1"])
    return block(h, params["w2"], params["g2"], params["be2"],
                 params["rm2"], params["rv2"])


if __name__ == "__main__":
    # Small shapes: batch=4 (so batch folding + 2 parallel grid steps both
    # engage), in_channels=4, mid=out=8 channels, 16x16 images.
    N, Cin, H, W = 4, 4, 16, 16
    Cmid = Cout = 8

    key = jax.random.PRNGKey(0)
    ks = jax.random.split(key, 10)

    params = {
        # Conv weights, PyTorch layout (Cout, Cin, KH, KW), bias=False.
        "w1": jax.random.normal(ks[0], (Cmid, Cin, 3, 3), jnp.float32) * 0.1,
        "w2": jax.random.normal(ks[1], (Cout, Cmid, 3, 3), jnp.float32) * 0.1,
        # BatchNorm params / running stats (deterministic, non-trivial).
        "g1": 1.0 + 0.1 * jax.random.normal(ks[2], (Cmid,), jnp.float32),
        "be1": 0.1 * jax.random.normal(ks[3], (Cmid,), jnp.float32),
        "rm1": 0.05 * jax.random.normal(ks[4], (Cmid,), jnp.float32),
        "rv1": 1.0 + 0.1 * jax.random.uniform(ks[5], (Cmid,), jnp.float32),
        "g2": 1.0 + 0.1 * jax.random.normal(ks[6], (Cout,), jnp.float32),
        "be2": 0.1 * jax.random.normal(ks[7], (Cout,), jnp.float32),
        "rm2": 0.05 * jax.random.normal(ks[8], (Cout,), jnp.float32),
        "rv2": jnp.linspace(0.9, 1.3, Cout, dtype=jnp.float32),
    }

    x = jax.random.normal(ks[9], (N, Cin, H, W), jnp.float32)

    out = jax.jit(double_conv_pallas)(x, params)
    out = jax.block_until_ready(out)

    ref = double_conv_reference(x, params)
    assert out.shape == (N, Cout, H, W), out.shape
    # bf16 MXU operands (f32 accumulation) vs. the pure-f32 lax reference:
    # expect ~1e-2-level error, so the tolerance is loosened accordingly.
    assert jnp.allclose(out, ref, atol=5e-2, rtol=5e-2), (
        float(jnp.max(jnp.abs(out - ref)))
    )
    print("KERNEL_OK")
</pallas_src>

<mosaic_0001>
module attributes {stable_mosaic.version = 11 : i64} {
  func.func @double_conv_kernel(%arg0: i32, %arg1: memref<2x16x256xf32, #tpu.memory_space<vmem>>, %arg2: memref<16x144xbf16, #tpu.memory_space<vmem>>, %arg3: memref<16x1xf32, #tpu.memory_space<vmem>>, %arg4: memref<8x144xbf16, #tpu.memory_space<vmem>>, %arg5: memref<8x1xf32, #tpu.memory_space<vmem>>, %arg6: memref<9x512xf32, #tpu.memory_space<vmem>>, %arg7: memref<2x8x256xf32, #tpu.memory_space<vmem>>) attributes {dimension_semantics = [#tpu.dimension_semantics<parallel>], iteration_bounds = array<i64: 2>, scalar_prefetch = 0 : i64, scratch_operands = 0 : i64, tpu.core_type = #tpu.core_type<tc>, window_params = [{transform_indices = @transform_0, window_bounds = array<i64: 2, 16, 256>}, {pipeline_mode = #tpu.pipeline_mode<synchronous>, transform_indices = @transform_1, window_bounds = array<i64: 16, 144>}, {pipeline_mode = #tpu.pipeline_mode<synchronous>, transform_indices = @transform_2, window_bounds = array<i64: 16, 1>}, {pipeline_mode = #tpu.pipeline_mode<synchronous>, transform_indices = @transform_3, window_bounds = array<i64: 8, 144>}, {pipeline_mode = #tpu.pipeline_mode<synchronous>, transform_indices = @transform_4, window_bounds = array<i64: 8, 1>}, {pipeline_mode = #tpu.pipeline_mode<synchronous>, transform_indices = @transform_5, window_bounds = array<i64: 9, 512>}, {transform_indices = @transform_6, window_bounds = array<i64: 2, 8, 256>}]} {
    %c0 = arith.constant 0 : index
    %c0_0 = arith.constant 0 : index
    %0 = vector.load %arg6[%c0, %c0_0] : memref<9x512xf32, #tpu.memory_space<vmem>>, vector<9x512xf32>
    %c0_1 = arith.constant 0 : index
    %c0_2 = arith.constant 0 : index
    %c0_3 = arith.constant 0 : index
    %1 = vector.load %arg1[%c0_1, %c0_2, %c0_3] : memref<2x16x256xf32, #tpu.memory_space<vmem>>, vector<1x16x256xf32>
    %2 = vector.shape_cast %1 : vector<1x16x256xf32> to vector<16x256xf32>
    %c1 = arith.constant 1 : index
    %c0_4 = arith.constant 0 : index
    %c0_5 = arith.constant 0 : index
    %3 = vector.load %arg1[%c1, %c0_4, %c0_5] : memref<2x16x256xf32, #tpu.memory_space<vmem>>, vector<1x16x256xf32>
    %4 = vector.shape_cast %3 : vector<1x16x256xf32> to vector<16x256xf32>
    %5 = tpu.concatenate %2, %4 in 1 : vector<16x256xf32>, vector<16x256xf32> -> vector<16x512xf32>
    %c0_6 = arith.constant 0 : index
    %c0_7 = arith.constant 0 : index
    %6 = vector.load %arg2[%c0_6, %c0_7] : memref<16x144xbf16, #tpu.memory_space<vmem>>, vector<16x144xbf16>
    %c17_i32 = arith.constant 17 : i32
    %7 = tpu.dynamic_rotate %5 by %c17_i32 dim 1 : vector<16x512xf32>, i32 -> vector<16x512xf32>
    %8 = vector.extract_strided_slice %0 {offsets = [0, 0], sizes = [1, 512], strides = [1, 1]} : vector<9x512xf32> to vector<1x512xf32>
    %9 = vector.broadcast %8 : vector<1x512xf32> to vector<16x512xf32>
    %10 = arith.mulf %7, %9 : vector<16x512xf32>
    %11 = arith.truncf %10 : vector<16x512xf32> to vector<16x512xbf16>
    %12 = vector.shape_cast %11 : vector<16x512xbf16> to vector<1x16x512xbf16>
    %c16_i32 = arith.constant 16 : i32
    %13 = tpu.dynamic_rotate %5 by %c16_i32 dim 1 : vector<16x512xf32>, i32 -> vector<16x512xf32>
    %14 = vector.extract_strided_slice %0 {offsets = [1, 0], sizes = [1, 512], strides = [1, 1]} : vector<9x512xf32> to vector<1x512xf32>
    %15 = vector.broadcast %14 : vector<1x512xf32> to vector<16x512xf32>
    %16 = arith.mulf %13, %15 : vector<16x512xf32>
    %17 = arith.truncf %16 : vector<16x512xf32> to vector<16x512xbf16>
    %18 = vector.shape_cast %17 : vector<16x512xbf16> to vector<1x16x512xbf16>
    %c15_i32 = arith.constant 15 : i32
    %19 = tpu.dynamic_rotate %5 by %c15_i32 dim 1 : vector<16x512xf32>, i32 -> vector<16x512xf32>
    %20 = vector.extract_strided_slice %0 {offsets = [2, 0], sizes = [1, 512], strides = [1, 1]} : vector<9x512xf32> to vector<1x512xf32>
    %21 = vector.broadcast %20 : vector<1x512xf32> to vector<16x512xf32>
    %22 = arith.mulf %19, %21 : vector<16x512xf32>
    %23 = arith.truncf %22 : vector<16x512xf32> to vector<16x512xbf16>
    %24 = vector.shape_cast %23 : vector<16x512xbf16> to vector<1x16x512xbf16>
    %c1_i32 = arith.constant 1 : i32
    %25 = tpu.dynamic_rotate %5 by %c1_i32 dim 1 : vector<16x512xf32>, i32 -> vector<16x512xf32>
    %26 = vector.extract_strided_slice %0 {offsets = [3, 0], sizes = [1, 512], strides = [1, 1]} : vector<9x512xf32> to vector<1x512xf32>
    %27 = vector.broadcast %26 : vector<1x512xf32> to vector<16x512xf32>
    %28 = arith.mulf %25, %27 : vector<16x512xf32>
    %29 = arith.truncf %28 : vector<16x512xf32> to vector<16x512xbf16>
    %30 = vector.shape_cast %29 : vector<16x512xbf16> to vector<1x16x512xbf16>
    %31 = arith.truncf %5 : vector<16x512xf32> to vector<16x512xbf16>
    %32 = vector.shape_cast %31 : vector<16x512xbf16> to vector<1x16x512xbf16>
    %c511_i32 = arith.constant 511 : i32
    %33 = tpu.dynamic_rotate %5 by %c511_i32 dim 1 : vector<16x512xf32>, i32 -> vector<16x512xf32>
    %34 = vector.extract_strided_slice %0 {offsets = [5, 0], sizes = [1, 512], strides = [1, 1]} : vector<9x512xf32> to vector<1x512xf32>
    %35 = vector.broadcast %34 : vector<1x512xf32> to vector<16x512xf32>
    %36 = arith.mulf %33, %35 : vector<16x512xf32>
    %37 = arith.truncf %36 : vector<16x512xf32> to vector<16x512xbf16>
    %38 = vector.shape_cast %37 : vector<16x512xbf16> to vector<1x16x512xbf16>
    %c497_i32 = arith.constant 497 : i32
    %39 = tpu.dynamic_rotate %5 by %c497_i32 dim 1 : vector<16x512xf32>, i32 -> vector<16x512xf32>
    %40 = vector.extract_strided_slice %0 {offsets = [6, 0], sizes = [1, 512], strides = [1, 1]} : vector<9x512xf32> to vector<1x512xf32>
    %41 = vector.broadcast %40 : vector<1x512xf32> to vector<16x512xf32>
    %42 = arith.mulf %39, %41 : vector<16x512xf32>
    %43 = arith.truncf %42 : vector<16x512xf32> to vector<16x512xbf16>
    %44 = vector.shape_cast %43 : vector<16x512xbf16> to vector<1x16x512xbf16>
    %c496_i32 = arith.constant 496 : i32
    %45 = tpu.dynamic_rotate %5 by %c496_i32 dim 1 : vector<16x512xf32>, i32 -> vector<16x512xf32>
    %46 = vector.extract_strided_slice %0 {offsets = [7, 0], sizes = [1, 512], strides = [1, 1]} : vector<9x512xf32> to vector<1x512xf32>
    %47 = vector.broadcast %46 : vector<1x512xf32> to vector<16x512xf32>
    %48 = arith.mulf %45, %47 : vector<16x512xf32>
    %49 = arith.truncf %48 : vector<16x512xf32> to vector<16x512xbf16>
    %50 = vector.shape_cast %49 : vector<16x512xbf16> to vector<1x16x512xbf16>
    %c495_i32 = arith.constant 495 : i32
    %51 = tpu.dynamic_rotate %5 by %c495_i32 dim 1 : vector<16x512xf32>, i32 -> vector<16x512xf32>
    %52 = vector.extract_strided_slice %0 {offsets = [8, 0], sizes = [1, 512], strides = [1, 1]} : vector<9x512xf32> to vector<1x512xf32>
    %53 = vector.broadcast %52 : vector<1x512xf32> to vector<16x512xf32>
    %54 = arith.mulf %51, %53 : vector<16x512xf32>
    %55 = arith.truncf %54 : vector<16x512xf32> to vector<16x512xbf16>
    %56 = vector.shape_cast %55 : vector<16x512xbf16> to vector<1x16x512xbf16>
    %57 = tpu.concatenate %12, %18, %24, %30, %32, %38, %44, %50, %56 in 0 : vector<1x16x512xbf16>, vector<1x16x512xbf16>, vector<1x16x512xbf16>, vector<1x16x512xbf16>, vector<1x16x512xbf16>, vector<1x16x512xbf16>, vector<1x16x512xbf16>, vector<1x16x512xbf16>, vector<1x16x512xbf16> -> vector<9x16x512xbf16>
    %58 = vector.shape_cast %57 : vector<9x16x512xbf16> to vector<144x512xbf16>
    %cst = arith.constant dense<0.000000e+00> : vector<16x512xf32>
    %59 = tpu.matmul %6, %58, %cst {dimension_numbers = #tpu.dot_dimension_numbers<[1], [0], [0], [1], [0, 0, 1, 1], [], []>} : vector<16x144xbf16>, vector<144x512xbf16>, vector<16x512xf32> -> vector<16x512xf32>
    %c0_8 = arith.constant 0 : index
    %c0_9 = arith.constant 0 : index
    %60 = vector.load %arg3[%c0_8, %c0_9] : memref<16x1xf32, #tpu.memory_space<vmem>>, vector<16x1xf32>
    %61 = vector.broadcast %60 : vector<16x1xf32> to vector<16x512xf32>
    %62 = arith.addf %59, %61 : vector<16x512xf32>
    %cst_10 = arith.constant 0.000000e+00 : f32
    %63 = vector.broadcast %cst_10 : f32 to vector<16x512xf32>
    %64 = arith.maximumf %62, %63 : vector<16x512xf32>
    %c0_11 = arith.constant 0 : index
    %c0_12 = arith.constant 0 : index
    %65 = vector.load %arg4[%c0_11, %c0_12] : memref<8x144xbf16, #tpu.memory_space<vmem>>, vector<8x144xbf16>
    %c17_i32_13 = arith.constant 17 : i32
    %66 = tpu.dynamic_rotate %64 by %c17_i32_13 dim 1 : vector<16x512xf32>, i32 -> vector<16x512xf32>
    %67 = vector.extract_strided_slice %0 {offsets = [0, 0], sizes = [1, 512], strides = [1, 1]} : vector<9x512xf32> to vector<1x512xf32>
    %68 = vector.broadcast %67 : vector<1x512xf32> to vector<16x512xf32>
    %69 = arith.mulf %66, %68 : vector<16x512xf32>
    %70 = arith.truncf %69 : vector<16x512xf32> to vector<16x512xbf16>
    %71 = vector.shape_cast %70 : vector<16x512xbf16> to vector<1x16x512xbf16>
    %c16_i32_14 = arith.constant 16 : i32
    %72 = tpu.dynamic_rotate %64 by %c16_i32_14 dim 1 : vector<16x512xf32>, i32 -> vector<16x512xf32>
    %73 = vector.extract_strided_slice %0 {offsets = [1, 0], sizes = [1, 512], strides = [1, 1]} : vector<9x512xf32> to vector<1x512xf32>
    %74 = vector.broadcast %73 : vector<1x512xf32> to vector<16x512xf32>
    %75 = arith.mulf %72, %74 : vector<16x512xf32>
    %76 = arith.truncf %75 : vector<16x512xf32> to vector<16x512xbf16>
    %77 = vector.shape_cast %76 : vector<16x512xbf16> to vector<1x16x512xbf16>
    %c15_i32_15 = arith.constant 15 : i32
    %78 = tpu.dynamic_rotate %64 by %c15_i32_15 dim 1 : vector<16x512xf32>, i32 -> vector<16x512xf32>
    %79 = vector.extract_strided_slice %0 {offsets = [2, 0], sizes = [1, 512], strides = [1, 1]} : vector<9x512xf32> to vector<1x512xf32>
    %80 = vector.broadcast %79 : vector<1x512xf32> to vector<16x512xf32>
    %81 = arith.mulf %78, %80 : vector<16x512xf32>
    %82 = arith.truncf %81 : vector<16x512xf32> to vector<16x512xbf16>
    %83 = vector.shape_cast %82 : vector<16x512xbf16> to vector<1x16x512xbf16>
    %c1_i32_16 = arith.constant 1 : i32
    %84 = tpu.dynamic_rotate %64 by %c1_i32_16 dim 1 : vector<16x512xf32>, i32 -> vector<16x512xf32>
    %85 = vector.extract_strided_slice %0 {offsets = [3, 0], sizes = [1, 512], strides = [1, 1]} : vector<9x512xf32> to vector<1x512xf32>
    %86 = vector.broadcast %85 : vector<1x512xf32> to vector<16x512xf32>
    %87 = arith.mulf %84, %86 : vector<16x512xf32>
    %88 = arith.truncf %87 : vector<16x512xf32> to vector<16x512xbf16>
    %89 = vector.shape_cast %88 : vector<16x512xbf16> to vector<1x16x512xbf16>
    %90 = arith.truncf %64 : vector<16x512xf32> to vector<16x512xbf16>
    %91 = vector.shape_cast %90 : vector<16x512xbf16> to vector<1x16x512xbf16>
    %c511_i32_17 = arith.constant 511 : i32
    %92 = tpu.dynamic_rotate %64 by %c511_i32_17 dim 1 : vector<16x512xf32>, i32 -> vector<16x512xf32>
    %93 = vector.extract_strided_slice %0 {offsets = [5, 0], sizes = [1, 512], strides = [1, 1]} : vector<9x512xf32> to vector<1x512xf32>
    %94 = vector.broadcast %93 : vector<1x512xf32> to vector<16x512xf32>
    %95 = arith.mulf %92, %94 : vector<16x512xf32>
    %96 = arith.truncf %95 : vector<16x512xf32> to vector<16x512xbf16>
    %97 = vector.shape_cast %96 : vector<16x512xbf16> to vector<1x16x512xbf16>
    %c497_i32_18 = arith.constant 497 : i32
    %98 = tpu.dynamic_rotate %64 by %c497_i32_18 dim 1 : vector<16x512xf32>, i32 -> vector<16x512xf32>
    %99 = vector.extract_strided_slice %0 {offsets = [6, 0], sizes = [1, 512], strides = [1, 1]} : vector<9x512xf32> to vector<1x512xf32>
    %100 = vector.broadcast %99 : vector<1x512xf32> to vector<16x512xf32>
    %101 = arith.mulf %98, %100 : vector<16x512xf32>
    %102 = arith.truncf %101 : vector<16x512xf32> to vector<16x512xbf16>
    %103 = vector.shape_cast %102 : vector<16x512xbf16> to vector<1x16x512xbf16>
    %c496_i32_19 = arith.constant 496 : i32
    %104 = tpu.dynamic_rotate %64 by %c496_i32_19 dim 1 : vector<16x512xf32>, i32 -> vector<16x512xf32>
    %105 = vector.extract_strided_slice %0 {offsets = [7, 0], sizes = [1, 512], strides = [1, 1]} : vector<9x512xf32> to vector<1x512xf32>
    %106 = vector.broadcast %105 : vector<1x512xf32> to vector<16x512xf32>
    %107 = arith.mulf %104, %106 : vector<16x512xf32>
    %108 = arith.truncf %107 : vector<16x512xf32> to vector<16x512xbf16>
    %109 = vector.shape_cast %108 : vector<16x512xbf16> to vector<1x16x512xbf16>
    %c495_i32_20 = arith.constant 495 : i32
    %110 = tpu.dynamic_rotate %64 by %c495_i32_20 dim 1 : vector<16x512xf32>, i32 -> vector<16x512xf32>
    %111 = vector.extract_strided_slice %0 {offsets = [8, 0], sizes = [1, 512], strides = [1, 1]} : vector<9x512xf32> to vector<1x512xf32>
    %112 = vector.broadcast %111 : vector<1x512xf32> to vector<16x512xf32>
    %113 = arith.mulf %110, %112 : vector<16x512xf32>
    %114 = arith.truncf %113 : vector<16x512xf32> to vector<16x512xbf16>
    %115 = vector.shape_cast %114 : vector<16x512xbf16> to vector<1x16x512xbf16>
    %116 = tpu.concatenate %71, %77, %83, %89, %91, %97, %103, %109, %115 in 0 : vector<1x16x512xbf16>, vector<1x16x512xbf16>, vector<1x16x512xbf16>, vector<1x16x512xbf16>, vector<1x16x512xbf16>, vector<1x16x512xbf16>, vector<1x16x512xbf16>, vector<1x16x512xbf16>, vector<1x16x512xbf16> -> vector<9x16x512xbf16>
    %117 = vector.shape_cast %116 : vector<9x16x512xbf16> to vector<144x512xbf16>
    %cst_21 = arith.constant dense<0.000000e+00> : vector<8x512xf32>
    %118 = tpu.matmul %65, %117, %cst_21 {dimension_numbers = #tpu.dot_dimension_numbers<[1], [0], [0], [1], [0, 0, 1, 1], [], []>} : vector<8x144xbf16>, vector<144x512xbf16>, vector<8x512xf32> -> vector<8x512xf32>
    %c0_22 = arith.constant 0 : index
    %c0_23 = arith.constant 0 : index
    %119 = vector.load %arg5[%c0_22, %c0_23] : memref<8x1xf32, #tpu.memory_space<vmem>>, vector<8x1xf32>
    %120 = vector.broadcast %119 : vector<8x1xf32> to vector<8x512xf32>
    %121 = arith.addf %118, %120 : vector<8x512xf32>
    %cst_24 = arith.constant 0.000000e+00 : f32
    %122 = vector.broadcast %cst_24 : f32 to vector<8x512xf32>
    %123 = arith.maximumf %121, %122 : vector<8x512xf32>
    %124 = vector.extract_strided_slice %123 {offsets = [0, 0], sizes = [8, 256], strides = [1, 1]} : vector<8x512xf32> to vector<8x256xf32>
    %c0_25 = arith.constant 0 : index
    %c0_26 = arith.constant 0 : index
    %c0_27 = arith.constant 0 : index
    %125 = vector.load %arg7[%c0_25, %c0_26, %c0_27] : memref<2x8x256xf32, #tpu.memory_space<vmem>>, vector<1x8x256xf32>
    %126 = vector.shape_cast %125 : vector<1x8x256xf32> to vector<8x256xf32>
    %127 = vector.shape_cast %124 : vector<8x256xf32> to vector<1x8x256xf32>
    tpu.vector_store %arg7[%c0_25, %c0_26, %c0_27], %127 {strides = array<i32>} : memref<2x8x256xf32, #tpu.memory_space<vmem>>, vector<1x8x256xf32>,
    %128 = vector.extract_strided_slice %123 {offsets = [0, 256], sizes = [8, 256], strides = [1, 1]} : vector<8x512xf32> to vector<8x256xf32>
    %c1_28 = arith.constant 1 : index
    %c0_29 = arith.constant 0 : index
    %c0_30 = arith.constant 0 : index
    %129 = vector.load %arg7[%c1_28, %c0_29, %c0_30] : memref<2x8x256xf32, #tpu.memory_space<vmem>>, vector<1x8x256xf32>
    %130 = vector.shape_cast %129 : vector<1x8x256xf32> to vector<8x256xf32>
    %131 = vector.shape_cast %128 : vector<8x256xf32> to vector<1x8x256xf32>
    tpu.vector_store %arg7[%c1_28, %c0_29, %c0_30], %131 {strides = array<i32>} : memref<2x8x256xf32, #tpu.memory_space<vmem>>, vector<1x8x256xf32>,
    return
  }
  func.func @transform_0(%arg0: i32) -> (i32, i32, i32) {
    %c0_i32 = arith.constant 0 : i32
    %c0_i32_0 = arith.constant 0 : i32
    %c0_i32_1 = arith.constant 0 : i32
    return %arg0, %c0_i32, %c0_i32_0 : i32, i32, i32
  }
  func.func @transform_1(%arg0: i32) -> (i32, i32) {
    %c0_i32 = arith.constant 0 : i32
    %c0_i32_0 = arith.constant 0 : i32
    %c0_i32_1 = arith.constant 0 : i32
    return %c0_i32, %c0_i32_0 : i32, i32
  }
  func.func @transform_2(%arg0: i32) -> (i32, i32) {
    %c0_i32 = arith.constant 0 : i32
    %c0_i32_0 = arith.constant 0 : i32
    %c0_i32_1 = arith.constant 0 : i32
    return %c0_i32, %c0_i32_0 : i32, i32
  }
  func.func @transform_3(%arg0: i32) -> (i32, i32) {
    %c0_i32 = arith.constant 0 : i32
    %c0_i32_0 = arith.constant 0 : i32
    %c0_i32_1 = arith.constant 0 : i32
    return %c0_i32, %c0_i32_0 : i32, i32
  }
  func.func @transform_4(%arg0: i32) -> (i32, i32) {
    %c0_i32 = arith.constant 0 : i32
    %c0_i32_0 = arith.constant 0 : i32
    %c0_i32_1 = arith.constant 0 : i32
    return %c0_i32, %c0_i32_0 : i32, i32
  }
  func.func @transform_5(%arg0: i32) -> (i32, i32) {
    %c0_i32 = arith.constant 0 : i32
    %c0_i32_0 = arith.constant 0 : i32
    %c0_i32_1 = arith.constant 0 : i32
    return %c0_i32, %c0_i32_0 : i32, i32
  }
  func.func @transform_6(%arg0: i32) -> (i32, i32, i32) {
    %c0_i32 = arith.constant 0 : i32
    %c0_i32_0 = arith.constant 0 : i32
    %c0_i32_1 = arith.constant 0 : i32
    return %arg0, %c0_i32, %c0_i32_0 : i32, i32, i32
  }
}

</mosaic_0001>

<bundles_post_ra>
// kernel: double_conv_pallas.1
= control target key start
LH: loop header
LB: loop body
LE: loop exit
PB: predicated region body
PF: predicated region fallthrough
CT: control target
= control target key end

     0   :  { %s1395_s21 = smov 0   ;;  %s2390_s0 = inlined_call_operand.vmem [shape: f32[4,16,256], index: 0, kind: input, shape index: {}]   ;;  %s2391_s1 = inlined_call_operand.vmem [shape: bf16[16,144], index: 1, kind: input, shape index: {}]   ;;  %s2392_s2 = inlined_call_operand.vmem [shape: f32[16,1], index: 2, kind: input, shape index: {}]   ;;  %s2393_s3 = inlined_call_operand.vmem [shape: bf16[8,144], index: 3, kind: input, shape index: {}]   ;;  %s2394_s4 = inlined_call_operand.vmem [shape: f32[8,1], index: 4, kind: input, shape index: {}]   ;;  %s2395_s5 = inlined_call_operand.vmem [shape: f32[9,512], index: 5, kind: input, shape index: {}]   ;;  %s2396_s6 = inlined_call_operand.vmem [shape: f32[4,8,256], index: 6, kind: output, shape index: {}]  }
   0x1 LB: > { %s1286_s22 = sadd.s32 4294967295, %s1349_s21   ;;  %p1290_p0 = scmp.ge.s32.totalorder %s1349_s21, 1  ;;  %s1349_s21 = sphi %s1395_s21, %s16_s21  }
   0x2   : > { %p214_p1 = scmp.lt.s32.totalorder %s1349_s21, 3 }
   0x4   : > { %p215_p2 = pnand %p1290_p0, %p214_p1 }
   0x6   : > { %218 = sbr.rel (%p215_p2) target bundleno = 916 (0x394), region = 44 }
   0xb   : > { %s1291_s23 = sshll.u32 %s1286_s22, 1  ;;  %s1351_s28 = smov 112   ;;  %v296_v8 = vlaneseq  ;;  %v1549_v12 = vld [vmem:[%s2395_s5 + $0x8] sm:$0xff]  ;;  %v1567_v18 = vld [vmem:[%s2395_s5] sm:$0xff]  ;;  %vm731_vm1 = vcmask 130048   ;;  %v1585_v25 = vld [vmem:[%s2395_s5 + $0x18] sm:$0xff] }
   0xc   : > { %p247_p3 = scmp.lt.s32.totalorder %s1291_s23, 3  ;;  %s1352_s29 = smov 113   ;;  %v1340_v16 = vld [vmem:[%s2391_s1 + $0x4] ss:$8 sps:$4 sm:$0xff]   ;;  %v1590_v26 = vld [vmem:[%s2395_s5 + $0x10] sm:$0xff]  ;;  %v1359_v30 = vmov 0  }
   0xd   : > { %s1353_s30 = smov 127   ;;  %s1354_s7 = smov 1   ;;  %v1537_v9 = vshrl.u32 %v296_v8, 7  ;;  %v1539_v10 = vand.u32 127, %v296_v8  ;;  %1307 = vmatprep.mubr.msk.bf16.mxu0 %vm731_vm1, %v1340_v16  ;;  %1308 = vmatprep.mubr.msk.bf16.mxu1 %vm731_vm1, %v1340_v16  ;;  %v710_v41 = vld [vmem:[%s2392_s2] sm:$0xff]  ;;  %v711_v42 = vld [vmem:[%s2392_s2 + $0x8] sm:$0xff] }
   0xe   : > { %s2490_s23 = smov (!%p247_p3, %s1291_s23), 3  ;;  %s1355_s8 = smov 15   ;;  %1336 = vset.pattern.permute.xlu0 %v1359_v30  ;;  %1337 = vset.pattern.permute.xlu1 %v1359_v30 }
   0xf   : > { %s1317_s24 = sshll.u32 %s2490_s23, 5  ;;  %s1356_s9 = smov 16   ;;  %v631_v11 = vsub.s32 7, %v1537_v9  ;;  %vm620_vm0 = vcmp.lt.s32.totalorder %v1539_v10, 112  ;;  %v578_v40 = vsub.s32 6, %v1537_v9  ;;  %vm567_vm2 = vcmp.lt.s32.totalorder %v1539_v10, 113 }
  0x10   : > { %s251_s27 = scalar_lea.vmem %s2390_s0, %s1317_s24  ;;  %s1357_s10 = smov 17   ;;  %vm514_vm3 = vcmp.lt.s32.totalorder %v1539_v10, 127  ;;  %vm457_vm4 = vcmp.lt.s32.totalorder %v1539_v10, 1  ;;  %vm404_vm5 = vcmp.lt.s32.totalorder %v1539_v10, 15  ;;  %vm351_vm6 = vcmp.lt.s32.totalorder %v1539_v10, 16 }
  0x11   : > { %v1409_v0 = vld [vmem:[%s251_s27 + $0x20] sm:$0xff]  ;;  %v1411_v1 = vld [vmem:[%s251_s27 + $0x8] sm:$0xff]  ;;  %v1417_v2 = vld [vmem:[%s251_s27 + $0x30] sm:$0xff]  ;;  %s1358_s11 = smov 111   ;;  %v1557_v15 = vrot.slane %v1549_v12, %v631_v11  ;;  %v1580_v24 = vrot.slane %v1567_v18, %v631_v11  ;;  %v1597_v33 = vrot.slane %v1585_v25, %v631_v11  ;;  %v1604_v36 = vrot.slane %v1590_v26, %v631_v11 }
  0x12   : > { %612 = vrot.lane.b32.xlu1 %v1409_v0, %s1351_s28  ;;  %608 = vrot.lane.b32.xlu0 %v1411_v1, %s1351_s28  ;;  %v1419_v3 = vld [vmem:[%s251_s27 + $0x18] sm:$0xff]  ;;  %v1425_v4 = vld [vmem:[%s251_s27 + $0x10] sm:$0xff]  ;;  %v1629_v55 = vrot.slane %v1549_v12, %v578_v40  ;;  %v1638_v62 = vrot.slane %v1567_v18, %v578_v40  ;;  %vm298_vm7 = vcmp.lt.s32.totalorder %v1539_v10, 17  ;;  %vm673_vm8 = vcmp.lt.s32.totalorder %v1539_v10, 111 }
  0x13   : > { %v1427_v5 = vld [vmem:[%s251_s27] sm:$0xff]  ;;  %v1433_v6 = vld [vmem:[%s251_s27 + $0x38] sm:$0xff]  ;;  %v1435_v7 = vld [vmem:[%s251_s27 + $0x28] sm:$0xff] }
  0x16   : > { %614 = vrot.lane.b32.xlu1 %v1417_v2, %s1351_s28  ;;  %610 = vrot.lane.b32.xlu0 %v1419_v3, %s1351_s28 }
  0x1a   : > { %606 = vrot.lane.b32.xlu1 %v1425_v4, %s1351_s28  ;;  %604 = vrot.lane.b32.xlu0 %v1427_v5, %s1351_s28 }
  0x1e   : > { %618 = vrot.lane.b32.xlu1 %v1433_v6, %s1351_s28  ;;  %616 = vrot.lane.b32.xlu0 %v1435_v7, %s1351_s28 }
  0x22   : > { %557 = vrot.lane.b32.xlu1 %v1419_v3, %s1352_s29  ;;  %555 = vrot.lane.b32.xlu0 %v1411_v1, %s1352_s29 }
  0x26   : > { %561 = vrot.lane.b32.xlu1 %v1417_v2, %s1352_s29  ;;  %559 = vrot.lane.b32.xlu0 %v1409_v0, %s1352_s29 }
  0x2a   : > { %553 = vrot.lane.b32.xlu1 %v1425_v4, %s1352_s29  ;;  %551 = vrot.lane.b32.xlu0 %v1427_v5, %s1352_s29 }
  0x2e   : > { %565 = vrot.lane.b32.xlu1 %v1433_v6, %s1352_s29  ;;  %563 = vrot.lane.b32.xlu0 %v1435_v7, %s1352_s29 }
  0x32   : > { %504 = vrot.lane.b32.xlu1 %v1419_v3, %s1353_s30  ;;  %502 = vrot.lane.b32.xlu0 %v1411_v1, %s1353_s30 }
  0x36   : > { %508 = vrot.lane.b32.xlu1 %v1417_v2, %s1353_s30  ;;  %506 = vrot.lane.b32.xlu0 %v1409_v0, %s1353_s30 }
  0x3a   : > { %500 = vrot.lane.b32.xlu1 %v1425_v4, %s1353_s30  ;;  %498 = vrot.lane.b32.xlu0 %v1427_v5, %s1353_s30 }
  0x3e   : > { %512 = vrot.lane.b32.xlu1 %v1433_v6, %s1353_s30  ;;  %510 = vrot.lane.b32.xlu0 %v1435_v7, %s1353_s30 }
  0x42   : > { %443 = vrot.lane.b32.xlu1 %v1425_v4, %s1354_s7  ;;  %441 = vrot.lane.b32.xlu0 %v1427_v5, %s1354_s7 }
  0x46   : > { %447 = vrot.lane.b32.xlu1 %v1419_v3, %s1354_s7  ;;  %445 = vrot.lane.b32.xlu0 %v1411_v1, %s1354_s7 }
  0x4a   : > { %451 = vrot.lane.b32.xlu1 %v1417_v2, %s1354_s7  ;;  %449 = vrot.lane.b32.xlu0 %v1409_v0, %s1354_s7 }
  0x4e   : > { %455 = vrot.lane.b32.xlu1 %v1433_v6, %s1354_s7  ;;  %453 = vrot.lane.b32.xlu0 %v1435_v7, %s1354_s7 }
  0x52   : > { %390 = vrot.lane.b32.xlu1 %v1425_v4, %s1355_s8  ;;  %388 = vrot.lane.b32.xlu0 %v1427_v5, %s1355_s8 }
  0x56   : > { %394 = vrot.lane.b32.xlu1 %v1419_v3, %s1355_s8  ;;  %392 = vrot.lane.b32.xlu0 %v1411_v1, %s1355_s8 }
  0x5a   : > { %398 = vrot.lane.b32.xlu1 %v1417_v2, %s1355_s8  ;;  %396 = vrot.lane.b32.xlu0 %v1409_v0, %s1355_s8 }
  0x5e   : > { %402 = vrot.lane.b32.xlu1 %v1433_v6, %s1355_s8  ;;  %400 = vrot.lane.b32.xlu0 %v1435_v7, %s1355_s8 }
  0x62   : > { %337 = vrot.lane.b32.xlu1 %v1425_v4, %s1356_s9  ;;  %335 = vrot.lane.b32.xlu0 %v1427_v5, %s1356_s9 }
  0x66   : > { %341 = vrot.lane.b32.xlu1 %v1419_v3, %s1356_s9  ;;  %339 = vrot.lane.b32.xlu0 %v1411_v1, %s1356_s9 }
  0x6a   : > { %345 = vrot.lane.b32.xlu1 %v1417_v2, %s1356_s9  ;;  %343 = vrot.lane.b32.xlu0 %v1409_v0, %s1356_s9 }
  0x6e   : > { %349 = vrot.lane.b32.xlu1 %v1433_v6, %s1356_s9  ;;  %347 = vrot.lane.b32.xlu0 %v1435_v7, %s1356_s9 }
  0x72   : > { %282 = vrot.lane.b32.xlu1 %v1425_v4, %s1357_s10  ;;  %280 = vrot.lane.b32.xlu0 %v1427_v5, %s1357_s10 }
  0x76   : > { %286 = vrot.lane.b32.xlu1 %v1419_v3, %s1357_s10  ;;  %284 = vrot.lane.b32.xlu0 %v1411_v1, %s1357_s10 }
  0x7a   : > { %290 = vrot.lane.b32.xlu1 %v1417_v2, %s1357_s10  ;;  %288 = vrot.lane.b32.xlu0 %v1409_v0, %s1357_s10 }
  0x7e   : > { %294 = vrot.lane.b32.xlu1 %v1433_v6, %s1357_s10  ;;  %292 = vrot.lane.b32.xlu0 %v1435_v7, %s1357_s10 }
  0x82   : > { %663 = vrot.lane.b32.xlu1 %v1419_v3, %s1358_s11  ;;  %661 = vrot.lane.b32.xlu0 %v1411_v1, %s1358_s11 }
  0x84   : > { %v613_v13 = vpop.permute.xlu1 %612  ;;  %v609_v14 = vpop.permute.xlu0 %608 }
  0x85   : > { %v623_v17 = vsel %vm620_vm0, %v609_v14, %v613_v13 }
  0x86   : > { %667 = vrot.lane.b32.xlu1 %v1417_v2, %s1358_s11  ;;  %665 = vrot.lane.b32.xlu0 %v1409_v0, %s1358_s11  ;;  %v646_v22 = vmul.f32 %v1557_v15, %v623_v17 }
  0x88   : > { %v615_v19 = vpop.permute.xlu1 %614  ;;  %v611_v20 = vpop.permute.xlu0 %610 }
  0x89   : > { %v624_v21 = vsel %vm620_vm0, %v611_v20, %v615_v19 }
  0x8a   : > { %659 = vrot.lane.b32.xlu1 %v1425_v4, %s1358_s11  ;;  %657 = vrot.lane.b32.xlu0 %v1427_v5, %s1358_s11  ;;  %v650_v23 = vmul.f32 %v1557_v15, %v624_v21 }
  0x8c   : > { %v607_v27 = vpop.permute.xlu1 %606  ;;  %v605_v28 = vpop.permute.xlu0 %604  ;;  %v654_v29 = vpack.c.bf16 %v650_v23, %v646_v22 }
  0x8d   : > { %v626_v31 = vsel %vm620_vm0, %v607_v27, %v611_v20  ;;  %v625_v32 = vsel %vm620_vm0, %v605_v28, %v609_v14  ;;  %v1650_v20 = vrot.slane %v1585_v25, %v578_v40 }
  0x8e   : > { %671 = vrot.lane.b32.xlu1 %v1433_v6, %s1358_s11  ;;  %735 = vmatprep.subr.bf16.mxu0 %v654_v29  ;;  %v645_v34 = vmul.f32 %v1580_v24, %v625_v32  ;;  %v649_v35 = vmul.f32 %v1580_v24, %v626_v31 }
  0x8f   : > { %669 = vrot.lane.b32.xlu0 %v1435_v7, %s1358_s11 }
  0x90   : > { %v619_v37 = vpop.permute.xlu1 %618  ;;  %v617_v38 = vpop.permute.xlu0 %616  ;;  %v653_v39 = vpack.c.bf16 %v649_v35, %v645_v34 }
  0x91   : > { %v622_v43 = vsel %vm620_vm0, %v615_v19, %v619_v37  ;;  %v621_v44 = vsel %vm620_vm0, %v613_v13, %v617_v38  ;;  %v627_v45 = vsel %vm620_vm0, %v617_v38, %v605_v28  ;;  %v628_v46 = vsel %vm620_vm0, %v619_v37, %v607_v27 }
  0x92   : > { %736 = vmatpush1.bf16.msra.mxu0 %v653_v39  ;;  %v648_v47 = vmul.f32 %v1597_v33, %v627_v45  ;;  %v652_v48 = vmul.f32 %v1597_v33, %v628_v46  ;;  %v647_v49 = vmul.f32 %v1604_v36, %v621_v44  ;;  %v651_v50 = vmul.f32 %v1604_v36, %v622_v43 }
  0x93   : > { %714 = vperm.xlu0 %1336, %v710_v41   ;;  %719 = vperm.xlu1 %1337, %v711_v42   ;;  %v1647_v19 = vrot.slane %v1590_v26, %v578_v40  ;;  %v525_v27 = vsub.s32 5, %v1537_v9 }
  0x94   : > { %v558_v51 = vpop.permute.xlu1 %557  ;;  %v556_v52 = vpop.permute.xlu0 %555  ;;  %v656_v53 = vpack.c.bf16 %v652_v48, %v648_v47  ;;  %v655_v54 = vpack.c.bf16 %v651_v50, %v647_v49 }
  0x95   : > { %v1667_v42 = vrot.slane %v1549_v12, %v525_v27  ;;  %v1676_v49 = vrot.slane %v1567_v18, %v525_v27 }
  0x96   : > { %778 = vmatprep.subr.bf16.mxu1 %v656_v53 }
  0x97   : > { %779 = vmatpush1.bf16.msra.mxu1 %v655_v54 }
  0x98   : > { %v562_v56 = vpop.permute.xlu1 %561  ;;  %v560_v57 = vpop.permute.xlu0 %559 }
  0x99   : > { %v571_v58 = vsel %vm567_vm2, %v558_v51, %v562_v56  ;;  %v570_v59 = vsel %vm567_vm2, %v556_v52, %v560_v57 }
  0x9a   : > { %v597_v60 = vmul.f32 %v1629_v55, %v571_v58  ;;  %v593_v61 = vmul.f32 %v1629_v55, %v570_v59  ;;  %v1685_v58 = vrot.slane %v1590_v26, %v525_v27  ;;  %v1688_v59 = vrot.slane %v1585_v25, %v525_v27 }
  0x9c   : > { %v554_v63 = vpop.permute.xlu1 %553  ;;  %v552_v8 = vpop.permute.xlu0 %551  ;;  %v601_v11 = vpack.c.bf16 %v597_v60, %v593_v61  ;;  %v495_v60 = vpack.c.bf16 %v1419_v3, %v1411_v1 }
  0x9d   : > { %v573_v13 = vsel %vm567_vm2, %v554_v63, %v558_v51  ;;  %v572_v14 = vsel %vm567_vm2, %v552_v8, %v556_v52 }
  0x9e   : > { %v596_v16 = vmul.f32 %v1638_v62, %v573_v13  ;;  %v592_v17 = vmul.f32 %v1638_v62, %v572_v14  ;;  %737 = vmatprep.subr.bf16.mxu0 %v601_v11  ;;  %v468_v11 = vsub.s32 3, %v1537_v9  ;;  %v494_v13 = vpack.c.bf16 %v1425_v4, %v1427_v5 }
  0xa0   : > { %v566_v21 = vpop.permute.xlu1 %565  ;;  %v564_v22 = vpop.permute.xlu0 %563  ;;  %v600_v23 = vpack.c.bf16 %v596_v16, %v592_v17 }
  0xa1   : > { %v569_v28 = vsel %vm567_vm2, %v562_v56, %v566_v21  ;;  %v575_v29 = vsel %vm567_vm2, %v566_v21, %v554_v63  ;;  %v568_v30 = vsel %vm567_vm2, %v560_v57, %v564_v22  ;;  %v574_v31 = vsel %vm567_vm2, %v564_v22, %v552_v8 }
  0xa2   : > { %v598_v32 = vmul.f32 %v1647_v19, %v569_v28  ;;  %v599_v34 = vmul.f32 %v1650_v20, %v575_v29  ;;  %v594_v35 = vmul.f32 %v1647_v19, %v568_v30  ;;  %v595_v37 = vmul.f32 %v1650_v20, %v574_v31  ;;  %738 = vmatpush1.bf16.msra.mxu0 %v600_v23 }
  0xa3   : > { %v497_v29 = vpack.c.bf16 %v1433_v6, %v1435_v7  ;;  %v1711_v30 = vrot.slane %v1549_v12, %v468_v11  ;;  %v496_v31 = vpack.c.bf16 %v1417_v2, %v1409_v0 }
  0xa4   : > { %v505_v38 = vpop.permute.xlu1 %504  ;;  %v503_v39 = vpop.permute.xlu0 %502  ;;  %v603_v40 = vpack.c.bf16 %v599_v34, %v595_v37  ;;  %v602_v41 = vpack.c.bf16 %v598_v32, %v594_v35 }
  0xa6   : > { %780 = vmatprep.subr.bf16.mxu1 %v603_v40 }
  0xa7   : > { %781 = vmatpush1.bf16.msra.mxu1 %v602_v41 }
  0xa8   : > { %v509_v43 = vpop.permute.xlu1 %508  ;;  %v507_v44 = vpop.permute.xlu0 %506 }
  0xa9   : > { %v518_v45 = vsel %vm514_vm3, %v505_v38, %v509_v43  ;;  %v517_v46 = vsel %vm514_vm3, %v503_v39, %v507_v44 }
  0xaa   : > { %v544_v47 = vmul.f32 %v1667_v42, %v518_v45  ;;  %v540_v48 = vmul.f32 %v1667_v42, %v517_v46 }
  0xac   : > { %v501_v50 = vpop.permute.xlu1 %500  ;;  %v499_v51 = vpop.permute.xlu0 %498  ;;  %v548_v52 = vpack.c.bf16 %v544_v47, %v540_v48 }
  0xad   : > { %v520_v53 = vsel %vm514_vm3, %v501_v50, %v505_v38  ;;  %v519_v54 = vsel %vm514_vm3, %v499_v51, %v503_v39  ;;  %v1722_v38 = vrot.slane %v1590_v26, %v468_v11 }
  0xae   : > { %v543_v56 = vmul.f32 %v1676_v49, %v520_v53  ;;  %v539_v57 = vmul.f32 %v1676_v49, %v519_v54  ;;  %739 = vmatprep.subr.bf16.mxu0 %v548_v52 }
  0xb0   : > { %v513_v61 = vpop.permute.xlu1 %512  ;;  %v511_v63 = vpop.permute.xlu0 %510  ;;  %v547_v8 = vpack.c.bf16 %v543_v56, %v539_v57 }
  0xb1   : > { %v516_v14 = vsel %vm514_vm3, %v509_v43, %v513_v61  ;;  %v522_v16 = vsel %vm514_vm3, %v513_v61, %v501_v50  ;;  %v515_v17 = vsel %vm514_vm3, %v507_v44, %v511_v63  ;;  %v521_v1 = vsel %vm514_vm3, %v511_v63, %v499_v51 }
  0xb2   : > { %v545_v3 = vmul.f32 %v1685_v58, %v516_v14  ;;  %v546_v21 = vmul.f32 %v1688_v59, %v522_v16  ;;  %v541_v22 = vmul.f32 %v1685_v58, %v515_v17  ;;  %v542_v4 = vmul.f32 %v1688_v59, %v521_v1  ;;  %740 = vmatpush1.bf16.msra.mxu0 %v547_v8 }
  0xb3   : > { %741 = vmatprep.subr.bf16.mxu0 %v495_v60  ;;  %v1729_v43 = vrot.slane %v1567_v18, %v468_v11  ;;  %v1732_v44 = vrot.slane %v1585_v25, %v468_v11  ;;  %v415_v50 = vsub.s32 2, %v1537_v9 }
  0xb4   : > { %v444_v5 = vpop.permute.xlu1 %443  ;;  %v442_v23 = vpop.permute.xlu0 %441  ;;  %v550_v27 = vpack.c.bf16 %v546_v21, %v542_v4  ;;  %v549_v28 = vpack.c.bf16 %v545_v3, %v541_v22 }
  0xb5   : > { %v1751_v16 = vrot.slane %v1549_v12, %v415_v50 }
  0xb6   : > { %782 = vmatprep.subr.bf16.mxu1 %v550_v27  ;;  %742 = vmatpush1.bf16.msra.mxu0 %v494_v13 }
  0xb7   : > { %783 = vmatpush1.bf16.msra.mxu1 %v549_v28 }
  0xb8   : > { %v448_v32 = vpop.permute.xlu1 %447  ;;  %v446_v34 = vpop.permute.xlu0 %445  ;;  %784 = vmatprep.subr.bf16.mxu1 %v497_v29 }
  0xb9   : > { %v463_v35 = vsel %vm457_vm4, %v444_v5, %v448_v32  ;;  %v462_v6 = vsel %vm457_vm4, %v442_v23, %v446_v34 }
  0xba   : > { %v487_v7 = vmul.f32 %v1711_v30, %v463_v35  ;;  %v483_v37 = vmul.f32 %v1711_v30, %v462_v6 }
  0xbb   : > { %785 = vmatpush1.bf16.msra.mxu1 %v496_v31 }
  0xbc   : > { %v452_v39 = vpop.permute.xlu1 %451  ;;  %v450_v40 = vpop.permute.xlu0 %449  ;;  %v491_v0 = vpack.c.bf16 %v487_v7, %v483_v37 }
  0xbd   : > { %v461_v2 = vsel %vm457_vm4, %v448_v32, %v452_v39  ;;  %v460_v41 = vsel %vm457_vm4, %v446_v34, %v450_v40  ;;  %v1767_v32 = vrot.slane %v1567_v18, %v415_v50  ;;  %v1770_v34 = vrot.slane %v1585_v25, %v415_v50 }
  0xbe   : > { %743 = vmatprep.subr.bf16.mxu0 %v491_v0  ;;  %v488_v45 = vmul.f32 %v1722_v38, %v461_v2  ;;  %v484_v46 = vmul.f32 %v1722_v38, %v460_v41 }
  0xbf   : > { %2436 = vst [vmem:[#allocation2_spill] sm:$0xff] %v1770_v34 }
  0xc0   : > { %v456_v47 = vpop.permute.xlu1 %455  ;;  %v454_v48 = vpop.permute.xlu0 %453  ;;  %v492_v14 = vpack.c.bf16 %v488_v45, %v484_v46 }
  0xc1   : > { %v459_v51 = vsel %vm457_vm4, %v452_v39, %v456_v47  ;;  %v465_v52 = vsel %vm457_vm4, %v456_v47, %v444_v5  ;;  %v458_v53 = vsel %vm457_vm4, %v450_v40, %v454_v48  ;;  %v464_v54 = vsel %vm457_vm4, %v454_v48, %v442_v23 }
  0xc2   : > { %v486_v56 = vmul.f32 %v1729_v43, %v465_v52  ;;  %v489_v57 = vmul.f32 %v1732_v44, %v459_v51  ;;  %v482_v60 = vmul.f32 %v1729_v43, %v464_v54  ;;  %v485_v61 = vmul.f32 %v1732_v44, %v458_v53 }
  0xc3   : > { %v1760_v5 = vrot.slane %v1590_v26, %v415_v50  ;;  %v362_v39 = vsub.s32 1, %v1537_v9 }
  0xc4   : > { %v391_v63 = vpop.permute.xlu1 %390  ;;  %v389_v8 = vpop.permute.xlu0 %388  ;;  %v490_v11 = vpack.c.bf16 %v486_v56, %v482_v60  ;;  %v493_v13 = vpack.c.bf16 %v489_v57, %v485_v61 }
  0xc5   : > { %v1789_v56 = vrot.slane %v1549_v12, %v362_v39 }
  0xc6   : > { %744 = vmatpush1.bf16.msra.mxu0 %v490_v11  ;;  %786 = vmatprep.subr.bf16.mxu1 %v493_v13  ;;  %v1798_v13 = vrot.slane %v1590_v26, %v362_v39 }
  0xc7   : > { %787 = vmatpush1.bf16.msra.mxu1 %v492_v14  ;;  %2437 = vst [vmem:[#allocation3_spill] sm:$0xff] %v1789_v56 }
  0xc8   : > { %v395_v17 = vpop.permute.xlu1 %394  ;;  %v393_v1 = vpop.permute.xlu0 %392  ;;  %2438 = vst [vmem:[#allocation4_spill] sm:$0xff] %v1798_v13 }
  0xc9   : > { %v410_v3 = vsel %vm404_vm5, %v391_v63, %v395_v17  ;;  %v409_v21 = vsel %vm404_vm5, %v389_v8, %v393_v1 }
  0xca   : > { %v434_v22 = vmul.f32 %v1751_v16, %v410_v3  ;;  %v430_v4 = vmul.f32 %v1751_v16, %v409_v21 }
  0xcc   : > { %v399_v23 = vpop.permute.xlu1 %398  ;;  %v397_v27 = vpop.permute.xlu0 %396  ;;  %v438_v28 = vpack.c.bf16 %v434_v22, %v430_v4  ;;  %v1805_v22 = vrot.slane %v1567_v18, %v362_v39  ;;  %v1808_v4 = vrot.slane %v1585_v25, %v362_v39 }
  0xcd   : > { %v408_v29 = vsel %vm404_vm5, %v395_v17, %v399_v23  ;;  %v407_v31 = vsel %vm404_vm5, %v393_v1, %v397_v27 }
  0xce   : > { %745 = vmatprep.subr.bf16.mxu0 %v438_v28  ;;  %v435_v35 = vmul.f32 %v1760_v5, %v408_v29  ;;  %v431_v6 = vmul.f32 %v1760_v5, %v407_v31  ;;  %2439 = vst [vmem:[#allocation5_spill] sm:$0xff] %v1805_v22  ;;  %2440 = vst [vmem:[#allocation6_spill] sm:$0xff] %v1808_v4  ;;  %v309_v31 = vsub.s32 0, %v1537_v9 }
  0xd0   : > { %v403_v7 = vpop.permute.xlu1 %402  ;;  %v401_v37 = vpop.permute.xlu0 %400  ;;  %v439_v54 = vpack.c.bf16 %v435_v35, %v431_v6 }
  0xd1   : > { %v406_v40 = vsel %vm404_vm5, %v399_v23, %v403_v7  ;;  %v412_v0 = vsel %vm404_vm5, %v403_v7, %v391_v63  ;;  %v405_v2 = vsel %vm404_vm5, %v397_v27, %v401_v37  ;;  %v411_v41 = vsel %vm404_vm5, %v401_v37, %v389_v8 }
  0xd2   : > { %v433_v45 = vmul.f32 %v1767_v32, %v412_v0  ;;  %v436_v46 = vmul.f32 %v1770_v34, %v406_v40  ;;  %v429_v47 = vmul.f32 %v1767_v32, %v411_v41  ;;  %v432_v48 = vmul.f32 %v1770_v34, %v405_v2 }
  0xd4   : > { %v338_v50 = vpop.permute.xlu1 %337  ;;  %v336_v51 = vpop.permute.xlu0 %335  ;;  %v437_v52 = vpack.c.bf16 %v433_v45, %v429_v47  ;;  %v440_v53 = vpack.c.bf16 %v436_v46, %v432_v48  ;;  %v1827_v48 = vrot.slane %v1549_v12, %v309_v31 }
  0xd6   : > { %746 = vmatpush1.bf16.msra.mxu0 %v437_v52  ;;  %788 = vmatprep.subr.bf16.mxu1 %v440_v53  ;;  %2441 = vst [vmem:[#allocation7_spill] sm:$0xff] %v1827_v48 }
  0xd7   : > { %789 = vmatpush1.bf16.msra.mxu1 %v439_v54 }
  0xd8   : > { %v342_v57 = vpop.permute.xlu1 %341  ;;  %v340_v60 = vpop.permute.xlu0 %339 }
  0xd9   : > { %v357_v61 = vsel %vm351_vm6, %v338_v50, %v342_v57  ;;  %v356_v63 = vsel %vm351_vm6, %v336_v51, %v340_v60 }
  0xda   : > { %v381_v8 = vmul.f32 %v1789_v56, %v357_v61  ;;  %v377_v11 = vmul.f32 %v1789_v56, %v356_v63 }
  0xdc   : > { %v346_v14 = vpop.permute.xlu1 %345  ;;  %v344_v17 = vpop.permute.xlu0 %343  ;;  %v385_v1 = vpack.c.bf16 %v381_v8, %v377_v11 }
  0xdd   : > { %v355_v3 = vsel %vm351_vm6, %v342_v57, %v346_v14  ;;  %v354_v21 = vsel %vm351_vm6, %v340_v60, %v344_v17  ;;  %v1836_v60 = vrot.slane %v1590_v26, %v309_v31 }
  0xde   : > { %747 = vmatprep.subr.bf16.mxu0 %v385_v1  ;;  %v382_v23 = vmul.f32 %v1798_v13, %v355_v3  ;;  %v378_v27 = vmul.f32 %v1798_v13, %v354_v21 }
  0xdf   : > { %2442 = vst [vmem:[#allocation8_spill] sm:$0xff] %v1836_v60 }
  0xe0   : > { %v350_v28 = vpop.permute.xlu1 %349  ;;  %v348_v29 = vpop.permute.xlu0 %347  ;;  %v386_v47 = vpack.c.bf16 %v382_v23, %v378_v27 }
  0xe1   : > { %v353_v35 = vsel %vm351_vm6, %v346_v14, %v350_v28  ;;  %v359_v6 = vsel %vm351_vm6, %v350_v28, %v338_v50  ;;  %v352_v7 = vsel %vm351_vm6, %v344_v17, %v348_v29  ;;  %v358_v37 = vsel %vm351_vm6, %v348_v29, %v336_v51 }
  0xe2   : > { %v380_v39 = vmul.f32 %v1805_v22, %v359_v6  ;;  %v383_v40 = vmul.f32 %v1808_v4, %v353_v35  ;;  %v376_v0 = vmul.f32 %v1805_v22, %v358_v37  ;;  %v379_v9 = vmul.f32 %v1808_v4, %v352_v7 }
  0xe3   : > { %v1843_v14 = vrot.slane %v1567_v18, %v309_v31  ;;  %v1846_v17 = vrot.slane %v1585_v25, %v309_v31 }
  0xe4   : > { %v283_v2 = vpop.permute.xlu1 %282  ;;  %v281_v41 = vpop.permute.xlu0 %280  ;;  %v384_v45 = vpack.c.bf16 %v380_v39, %v376_v0  ;;  %v387_v46 = vpack.c.bf16 %v383_v40, %v379_v9  ;;  %v1866_v0 = vld [vmem:[%s2395_s5 + $0x28] ss:$0 sm:$0xff] }
  0xe5   : > { %2443 = vst [vmem:[#allocation9_spill] sm:$0xff] %v1843_v14  ;;  %2444 = vst [vmem:[#allocation10_spill] sm:$0xff] %v1846_v17 }
  0xe6   : > { %748 = vmatpush1.bf16.msra.mxu0 %v384_v45  ;;  %790 = vmatprep.subr.bf16.mxu1 %v387_v46  ;;  %2445 = vst [vmem:[#allocation11_spill] sm:$0xff] %v1866_v0 }
  0xe7   : > { %791 = vmatpush1.bf16.msra.mxu1 %v386_v47 }
  0xe8   : > { %v287_v50 = vpop.permute.xlu1 %286  ;;  %v285_v51 = vpop.permute.xlu0 %284 }
  0xe9   : > { %v304_v52 = vsel %vm298_vm7, %v283_v2, %v287_v50  ;;  %v303_v53 = vsel %vm298_vm7, %v281_v41, %v285_v51 }
  0xea   : > { %v328_v54 = vmul.f32 %v1827_v48, %v304_v52  ;;  %v324_v57 = vmul.f32 %v1827_v48, %v303_v53 }
  0xec   : > { %v291_v61 = vpop.permute.xlu1 %290  ;;  %v289_v63 = vpop.permute.xlu0 %288  ;;  %v332_v12 = vpack.c.bf16 %v328_v54, %v324_v57 }
  0xed   : > { %v302_v8 = vsel %vm298_vm7, %v287_v50, %v291_v61  ;;  %v301_v11 = vsel %vm298_vm7, %v285_v51, %v289_v63  ;;  %v1877_v50 = vld [vmem:[%s2395_s5 + $0x20] ss:$0 sm:$0xff] }
  0xee   : > { %749 = vmatprep.subr.bf16.mxu0 %v332_v12  ;;  %v329_v1 = vmul.f32 %v1836_v60, %v302_v8  ;;  %v325_v26 = vmul.f32 %v1836_v60, %v301_v11  ;;  %2446 = vst [vmem:[#allocation12_spill] sm:$0xff] %v1877_v50  ;;  %v1888_v12 = vld [vmem:[%s2395_s5 + $0x30] ss:$0 sm:$0xff]  ;;  %v1893_v8 = vld [vmem:[%s2395_s5 + $0x38] ss:$0 sm:$0xff] }
  0xef   : > { %2447 = vst [vmem:[#allocation13_spill] sm:$0xff] %v1888_v12  ;;  %2448 = vst [vmem:[#allocation14_spill] sm:$0xff] %v1893_v8 }
  0xf0   : > { %v295_v3 = vpop.permute.xlu1 %294  ;;  %v293_v21 = vpop.permute.xlu0 %292  ;;  %v333_v40 = vpack.c.bf16 %v329_v1, %v325_v26 }
  0xf1   : > { %v300_v23 = vsel %vm298_vm7, %v291_v61, %v295_v3  ;;  %v306_v27 = vsel %vm298_vm7, %v295_v3, %v283_v2  ;;  %v299_v28 = vsel %vm298_vm7, %v289_v63, %v293_v21  ;;  %v305_v18 = vsel %vm298_vm7, %v293_v21, %v281_v41 }
  0xf2   : > { %v327_v25 = vmul.f32 %v1843_v14, %v306_v27  ;;  %v330_v29 = vmul.f32 %v1846_v17, %v300_v23  ;;  %v323_v31 = vmul.f32 %v1843_v14, %v305_v18  ;;  %v326_v35 = vmul.f32 %v1846_v17, %v299_v28  ;;  %v1338_v23 = vld [vmem:[%s2391_s1] ss:$8 sps:$4 sm:$0xff]  }
  0xf4   : > { %v664_v6 = vpop.permute.xlu1 %663  ;;  %v662_v7 = vpop.permute.xlu0 %661  ;;  %v331_v37 = vpack.c.bf16 %v327_v25, %v323_v31  ;;  %v334_v39 = vpack.c.bf16 %v330_v29, %v326_v35 }
  0xf6   : > { %750 = vmatpush1.bf16.msra.mxu0 %v331_v37  ;;  %792 = vmatprep.subr.bf16.mxu1 %v334_v39 }
  0xf7   : > { %793 = vmatpush1.bf16.msra.mxu1 %v333_v40 }
  0xf8   : > { %v668_v9 = vpop.permute.xlu1 %667  ;;  %v666_v2 = vpop.permute.xlu0 %665 }
  0xf9   : > { %v677_v41 = vsel %vm673_vm8, %v664_v6, %v668_v9  ;;  %v676_v45 = vsel %vm673_vm8, %v662_v7, %v666_v2 }
  0xfa   : > { %v703_v46 = vmul.f32 %v1866_v0, %v677_v41  ;;  %v699_v47 = vmul.f32 %v1866_v0, %v676_v45 }
  0xfc   : > { %v660_v51 = vpop.permute.xlu1 %659  ;;  %v658_v52 = vpop.permute.xlu0 %657  ;;  %v707_v53 = vpack.c.bf16 %v703_v46, %v699_v47 }
  0xfd   : > { %v679_v54 = vsel %vm673_vm8, %v660_v51, %v664_v6  ;;  %v678_v57 = vsel %vm673_vm8, %v658_v52, %v662_v7 }
  0xfe   : > { %v702_v61 = vmul.f32 %v1877_v50, %v679_v54  ;;  %v698_v63 = vmul.f32 %v1877_v50, %v678_v57  ;;  %765 = vmatprep.subr.bf16.mxu0 %v707_v53 }
 0x100   : > { %v672_v11 = vpop.permute.xlu1 %671  ;;  %v706_v1 = vpack.c.bf16 %v702_v61, %v698_v63 }
 0x101   : > { %v675_v26 = vsel %vm673_vm8, %v668_v9, %v672_v11  ;;  %v681_v3 = vsel %vm673_vm8, %v672_v11, %v660_v51  ;;  %v670_v21 = vpop.permute.xlu0 %669 }
 0x102   : > { %v704_v27 = vmul.f32 %v1888_v12, %v675_v26  ;;  %v705_v28 = vmul.f32 %v1893_v8, %v681_v3  ;;  %v674_v18 = vsel %vm673_vm8, %v666_v2, %v670_v21  ;;  %v680_v25 = vsel %vm673_vm8, %v670_v21, %v658_v52  ;;  %766 = vmatpush2.bf16.msra.mxu0 %v706_v1 }
 0x103   : > { %v700_v29 = vmul.f32 %v1888_v12, %v674_v18  ;;  %v701_v31 = vmul.f32 %v1893_v8, %v680_v25 }
 0x105   : > { %v709_v35 = vpack.c.bf16 %v705_v28, %v701_v31  ;;  %v708_v6 = vpack.c.bf16 %v704_v27, %v700_v29  ;;  %768 = vmatmul.mubr.bf16.vlgmr.msra.gmra.mxu0 %v1338_v23  ;;  %v2049_v31 = vld [vmem:[%s2393_s3] sm:$0xff] }
 0x106   : > { %2449 = vst [vmem:[#allocation15_spill] sm:$0xff] %v2049_v31 }
 0x107   : > { %808 = vmatprep.subr.bf16.mxu1 %v709_v35 }
 0x108   : > { %809 = vmatpush2.bf16.msra.mxu1 %v708_v6 }
 0x10b   : > { %811 = vmatmul.mubr.bf16.vlgmr.msra.gmra.mxu1 %v1338_v23 }
 0x10e   : > { %v715_v37 = vpop.permute.xlu0 %714  ;;  %v720_v2 = vpop.permute.xlu1 %719 }
 0x1c5   : > { %v769_v7 = vpop.f32.mrf.mxu0 }
 0x1c6   : > { %v770_v40 = vadd.f32 %v769_v7, %v715_v37  ;;  %v1310_v7 = vcombine.high %v2049_v31, %v2049_v31 }
 0x1c7   : > { %v771_v41 = vpop.f32.mrf.mxu0 }
 0x1c8   : > { %v1912_v51 = vmax.f32 %v770_v40, 0.0  ;;  %v772_v11 = vadd.f32 %v771_v41, %v715_v37  ;;  %1311 = vmatprep.mubr.msk.bf16.mxu0 %vm731_vm1, %v1310_v7  ;;  %1312 = vmatprep.mubr.msk.bf16.mxu1 %vm731_vm1, %v1310_v7  ;;  %v1122_v40 = vld [vmem:[%s2394_s4] sm:$0xff] }
 0x1c9   : > { %v773_v53 = vpop.f32.mrf.mxu0 }
 0x1ca   : > { %v774_v54 = vadd.f32 %v773_v53, %v720_v2  ;;  %v1982_v26 = vmax.f32 %v772_v11, 0.0 }
 0x1cb   : > { %v812_v39 = vpop.f32.mrf.mxu1  ;;  %v775_v1 = vpop.f32.mrf.mxu0 }
 0x1cc   : > { %v813_v9 = vadd.f32 %v812_v39, %v715_v37  ;;  %v1924_v63 = vmax.f32 %v774_v54, 0.0  ;;  %v776_v21 = vadd.f32 %v775_v1, %v720_v2 }
 0x1cd   : > { %v814_v45 = vpop.f32.mrf.mxu1 }
 0x1ce   : > { %v1910_v46 = vmax.f32 %v813_v9, 0.0  ;;  %v815_v3 = vadd.f32 %v814_v45, %v715_v37  ;;  %v1990_v28 = vmax.f32 %v776_v21, 0.0 }
 0x1cf   : > { %v816_v47 = vpop.f32.mrf.mxu1 }
 0x1d0   : > { %v817_v52 = vadd.f32 %v816_v47, %v720_v2  ;;  %1058 = vrot.lane.b32.xlu1 %v1910_v46, %s1351_s28  ;;  %v1988_v27 = vmax.f32 %v815_v3, 0.0 }
 0x1d1   : > { %v818_v23 = vpop.f32.mrf.mxu1 }
 0x1d2   : > { %v1916_v57 = vmax.f32 %v817_v52, 0.0  ;;  %v819_v18 = vadd.f32 %v818_v23, %v720_v2 }
 0x1d4   : > { %1060 = vrot.lane.b32.xlu0 %v1916_v57, %s1351_s28  ;;  %1050 = vrot.lane.b32.xlu1 %v1912_v51, %s1351_s28  ;;  %v1996_v25 = vmax.f32 %v819_v18, 0.0 }
 0x1d8   : > { %1052 = vrot.lane.b32.xlu0 %v1924_v63, %s1351_s28  ;;  %1022 = vrot.lane.b32.xlu1 %v1910_v46, %s1352_s29 }
 0x1dc   : > { %1024 = vrot.lane.b32.xlu0 %v1916_v57, %s1352_s29  ;;  %1014 = vrot.lane.b32.xlu1 %v1912_v51, %s1352_s29 }
 0x1e0   : > { %1016 = vrot.lane.b32.xlu0 %v1924_v63, %s1352_s29  ;;  %986 = vrot.lane.b32.xlu1 %v1910_v46, %s1353_s30 }
 0x1e4   : > { %988 = vrot.lane.b32.xlu0 %v1916_v57, %s1353_s30  ;;  %978 = vrot.lane.b32.xlu1 %v1912_v51, %s1353_s30 }
 0x1e8   : > { %980 = vrot.lane.b32.xlu0 %v1924_v63, %s1353_s30  ;;  %938 = vrot.lane.b32.xlu1 %v1912_v51, %s1354_s7 }
 0x1ec   : > { %940 = vrot.lane.b32.xlu0 %v1924_v63, %s1354_s7  ;;  %946 = vrot.lane.b32.xlu1 %v1910_v46, %s1354_s7 }
 0x1f0   : > { %948 = vrot.lane.b32.xlu0 %v1916_v57, %s1354_s7  ;;  %902 = vrot.lane.b32.xlu1 %v1912_v51, %s1355_s8 }
 0x1f4   : > { %904 = vrot.lane.b32.xlu0 %v1924_v63, %s1355_s8  ;;  %910 = vrot.lane.b32.xlu1 %v1910_v46, %s1355_s8 }
 0x1f8   : > { %912 = vrot.lane.b32.xlu0 %v1916_v57, %s1355_s8  ;;  %866 = vrot.lane.b32.xlu1 %v1912_v51, %s1356_s9 }
 0x1fc   : > { %868 = vrot.lane.b32.xlu0 %v1924_v63, %s1356_s9  ;;  %874 = vrot.lane.b32.xlu1 %v1910_v46, %s1356_s9 }
 0x200   : > { %876 = vrot.lane.b32.xlu0 %v1916_v57, %s1356_s9  ;;  %830 = vrot.lane.b32.xlu1 %v1912_v51, %s1357_s10 }
 0x204   : > { %832 = vrot.lane.b32.xlu0 %v1924_v63, %s1357_s10  ;;  %838 = vrot.lane.b32.xlu1 %v1910_v46, %s1357_s10 }
 0x208   : > { %840 = vrot.lane.b32.xlu0 %v1916_v57, %s1357_s10  ;;  %1094 = vrot.lane.b32.xlu1 %v1910_v46, %s1358_s11 }
 0x20c   : > { %1096 = vrot.lane.b32.xlu0 %v1916_v57, %s1358_s11  ;;  %1086 = vrot.lane.b32.xlu1 %v1912_v51, %s1358_s11 }
 0x210   : > { %1088 = vrot.lane.b32.xlu0 %v1924_v63, %s1358_s11  ;;  %1054 = vrot.lane.b32.xlu1 %v1982_v26, %s1351_s28 }
 0x214   : > { %1056 = vrot.lane.b32.xlu0 %v1990_v28, %s1351_s28  ;;  %1062 = vrot.lane.b32.xlu1 %v1988_v27, %s1351_s28 }
 0x218   : > { %1064 = vrot.lane.b32.xlu0 %v1996_v25, %s1351_s28  ;;  %1018 = vrot.lane.b32.xlu1 %v1982_v26, %s1352_s29 }
 0x21c   : > { %1020 = vrot.lane.b32.xlu0 %v1990_v28, %s1352_s29  ;;  %1026 = vrot.lane.b32.xlu1 %v1988_v27, %s1352_s29 }
 0x220   : > { %1028 = vrot.lane.b32.xlu0 %v1996_v25, %s1352_s29  ;;  %982 = vrot.lane.b32.xlu1 %v1982_v26, %s1353_s30 }
 0x224   : > { %984 = vrot.lane.b32.xlu0 %v1990_v28, %s1353_s30  ;;  %990 = vrot.lane.b32.xlu1 %v1988_v27, %s1353_s30 }
 0x228   : > { %992 = vrot.lane.b32.xlu0 %v1996_v25, %s1353_s30  ;;  %942 = vrot.lane.b32.xlu1 %v1982_v26, %s1354_s7 }
 0x22c   : > { %944 = vrot.lane.b32.xlu0 %v1990_v28, %s1354_s7  ;;  %950 = vrot.lane.b32.xlu1 %v1988_v27, %s1354_s7 }
 0x230   : > { %952 = vrot.lane.b32.xlu0 %v1996_v25, %s1354_s7  ;;  %906 = vrot.lane.b32.xlu1 %v1982_v26, %s1355_s8 }
 0x234   : > { %908 = vrot.lane.b32.xlu0 %v1990_v28, %s1355_s8  ;;  %914 = vrot.lane.b32.xlu1 %v1988_v27, %s1355_s8 }
 0x238   : > { %916 = vrot.lane.b32.xlu0 %v1996_v25, %s1355_s8  ;;  %870 = vrot.lane.b32.xlu1 %v1982_v26, %s1356_s9  ;;  %s1318_s8 = sshll.u32 %s2490_s23, 4 }
 0x23c   : > { %872 = vrot.lane.b32.xlu0 %v1990_v28, %s1356_s9  ;;  %878 = vrot.lane.b32.xlu1 %v1988_v27, %s1356_s9 }
 0x240   : > { %880 = vrot.lane.b32.xlu0 %v1996_v25, %s1356_s9  ;;  %834 = vrot.lane.b32.xlu1 %v1982_v26, %s1357_s10 }
 0x242   : > { %v1059_v29 = vpop.permute.xlu1 %1058 }
 0x244   : > { %836 = vrot.lane.b32.xlu0 %v1990_v28, %s1357_s10  ;;  %842 = vrot.lane.b32.xlu1 %v1988_v27, %s1357_s10 }
 0x246   : > { %v1061_v35 = vpop.permute.xlu0 %1060  ;;  %v1051_v6 = vpop.permute.xlu1 %1050 }
 0x248   : > { %844 = vrot.lane.b32.xlu0 %v1996_v25, %s1357_s10  ;;  %1090 = vrot.lane.b32.xlu1 %v1982_v26, %s1358_s11 }
 0x24a   : > { %v1053_v37 = vpop.permute.xlu0 %1052  ;;  %v2059_v39 = vpop.permute.xlu1 %1022 }
 0x24c   : > { %1092 = vrot.lane.b32.xlu0 %v1990_v28, %s1358_s11  ;;  %1098 = vrot.lane.b32.xlu1 %v1988_v27, %s1358_s11 }
 0x24e   : > { %v2068_v9 = vpop.permute.xlu0 %1024  ;;  %v2070_v2 = vpop.permute.xlu1 %1014 }
 0x250   : > { %1100 = vrot.lane.b32.xlu0 %v1996_v25, %s1358_s11  ;;  %1125 = vperm.xlu1 %1337, %v1122_v40   ;;  %s258_s11 = scalar_lea.vmem %s2396_s6, %s1318_s8 }
 0x252   : > { %v2074_v41 = vpop.permute.xlu0 %1016  ;;  %v2076_v45 = vpop.permute.xlu1 %986 }
 0x256   : > { %v2078_v47 = vpop.permute.xlu0 %988  ;;  %v2080_v52 = vpop.permute.xlu1 %978 }
 0x25a   : > { %v2082_v53 = vpop.permute.xlu0 %980  ;;  %v2084_v54 = vpop.permute.xlu1 %938 }
 0x25e   : > { %v2086_v11 = vpop.permute.xlu0 %940  ;;  %v2088_v1 = vpop.permute.xlu1 %946 }
 0x262   : > { %v2090_v3 = vpop.permute.xlu0 %948  ;;  %v2092_v21 = vpop.permute.xlu1 %902 }
 0x266   : > { %v2094_v23 = vpop.permute.xlu0 %904  ;;  %v2096_v18 = vpop.permute.xlu1 %910 }
 0x26a   : > { %v2098_v7 = vpop.permute.xlu0 %912  ;;  %v2100_v40 = vpop.permute.xlu1 %866 }
 0x26b   : > { %2450 = vst [vmem:[#allocation16_spill] sm:$0xff] %v2100_v40 }
 0x26e   : > { %v2102_v61 = vpop.permute.xlu0 %868  ;;  %v2104_v8 = vpop.permute.xlu1 %874 }
 0x26f   : > { %2451 = vst [vmem:[#allocation17_spill] sm:$0xff] %v2102_v61  ;;  %2452 = vst [vmem:[#allocation18_spill] sm:$0xff] %v2104_v8 }
 0x272   : > { %v2106_v12 = vpop.permute.xlu0 %876  ;;  %v2108_v31 = vpop.permute.xlu1 %830 }
 0x273   : > { %2453 = vst [vmem:[#allocation19_spill] sm:$0xff] %v2106_v12  ;;  %2454 = vst [vmem:[#allocation20_spill] sm:$0xff] %v2108_v31 }
 0x276   : > { %v2110_v0 = vpop.permute.xlu0 %832  ;;  %v2112_v50 = vpop.permute.xlu1 %838 }
 0x277   : > { %2455 = vst [vmem:[#allocation21_spill] sm:$0xff] %v2110_v0  ;;  %2456 = vst [vmem:[#allocation22_spill] sm:$0xff] %v2112_v50 }
 0x27a   : > { %v2114_v17 = vpop.permute.xlu0 %840  ;;  %v2116_v14 = vpop.permute.xlu1 %1094 }
 0x27b   : > { %2457 = vst [vmem:[#allocation23_spill] sm:$0xff] %v2114_v17  ;;  %2458 = vst [vmem:[#allocation24_spill] sm:$0xff] %v2116_v14 }
 0x27e   : > { %v2118_v60 = vpop.permute.xlu0 %1096  ;;  %v2120_v48 = vpop.permute.xlu1 %1086 }
 0x27f   : > { %2459 = vst [vmem:[#allocation25_spill] sm:$0xff] %v2118_v60  ;;  %2460 = vst [vmem:[#allocation26_spill] sm:$0xff] %v2120_v48 }
 0x282   : > { %v2122_v4 = vpop.permute.xlu0 %1088  ;;  %v1055_v22 = vpop.permute.xlu1 %1054 }
 0x283   : > { %2461 = vst [vmem:[#allocation27_spill] sm:$0xff] %v2122_v4  ;;  %v1068_v13 = vsel %vm620_vm0, %v1055_v22, %v1059_v29  ;;  %v1070_v31 = vsel %vm620_vm0, %v1051_v6, %v1055_v22 }
 0x284   : > { %v1074_v60 = vmul.f32 %v1070_v31, %v1580_v24  ;;  %v1075_v48 = vmul.f32 %v1068_v13, %v1557_v15 }
 0x286   : > { %v1057_v0 = vpop.permute.xlu0 %1056  ;;  %v1063_v56 = vpop.permute.xlu1 %1062 }
 0x287   : > { %v1069_v17 = vsel %vm620_vm0, %v1057_v0, %v1061_v35  ;;  %v1071_v14 = vsel %vm620_vm0, %v1053_v37, %v1057_v0  ;;  %v1066_v61 = vsel %vm620_vm0, %v1059_v29, %v1063_v56  ;;  %v1072_v22 = vsel %vm620_vm0, %v1063_v56, %v1051_v6 }
 0x288   : > { %v1078_v4 = vmul.f32 %v1071_v14, %v1580_v24  ;;  %v1079_v50 = vmul.f32 %v1069_v17, %v1557_v15  ;;  %v1076_v24 = vmul.f32 %v1066_v61, %v1604_v36  ;;  %v1077_v15 = vmul.f32 %v1072_v22, %v1597_v33 }
 0x28a   : > { %v1082_v12 = vpack.c.bf16 %v1078_v4, %v1074_v60  ;;  %v1065_v40 = vpop.permute.xlu0 %1064  ;;  %v1019_v8 = vpop.permute.xlu1 %1018  ;;  %v1083_v34 = vpack.c.bf16 %v1079_v50, %v1075_v48 }
 0x28b   : > { %v1067_v0 = vsel %vm620_vm0, %v1061_v35, %v1065_v40  ;;  %v1073_v13 = vsel %vm620_vm0, %v1065_v40, %v1053_v37  ;;  %v1032_v56 = vsel %vm567_vm2, %v1019_v8, %v2059_v39  ;;  %v1034_v4 = vsel %vm567_vm2, %v2070_v2, %v1019_v8 }
 0x28c   : > { %v1080_v14 = vmul.f32 %v1067_v0, %v1604_v36  ;;  %v1081_v17 = vmul.f32 %v1073_v13, %v1597_v33  ;;  %1137 = vmatprep.subr.bf16.mxu0 %v1083_v34  ;;  %v1038_v34 = vmul.f32 %v1034_v4, %v1638_v62  ;;  %v1039_v29 = vmul.f32 %v1032_v56, %v1629_v55 }
 0x28d   : > { %1138 = vmatpush1.bf16.msra.mxu0 %v1082_v12 }
 0x28e   : > { %v1084_v48 = vpack.c.bf16 %v1080_v14, %v1076_v24  ;;  %v1021_v60 = vpop.permute.xlu0 %1020  ;;  %v1027_v50 = vpop.permute.xlu1 %1026  ;;  %v1085_v61 = vpack.c.bf16 %v1081_v17, %v1077_v15 }
 0x28f   : > { %v1033_v36 = vsel %vm567_vm2, %v1021_v60, %v2068_v9  ;;  %v1035_v33 = vsel %vm567_vm2, %v2074_v41, %v1021_v60  ;;  %v1030_v8 = vsel %vm567_vm2, %v2059_v39, %v1027_v50  ;;  %v1036_v35 = vsel %vm567_vm2, %v1027_v50, %v2070_v2 }
 0x290   : > { %v1042_v31 = vmul.f32 %v1035_v33, %v1638_v62  ;;  %v1043_v12 = vmul.f32 %v1033_v36, %v1629_v55  ;;  %1178 = vmatprep.subr.bf16.mxu1 %v1085_v61  ;;  %v1040_v0 = vmul.f32 %v1030_v8, %v1647_v19  ;;  %v1041_v39 = vmul.f32 %v1036_v35, %v1650_v20 }
 0x291   : > { %1179 = vmatpush1.bf16.msra.mxu1 %v1084_v48 }
 0x292   : > { %v1046_v6 = vpack.c.bf16 %v1042_v31, %v1038_v34  ;;  %v1029_v37 = vpop.permute.xlu0 %1028  ;;  %v983_v40 = vpop.permute.xlu1 %982  ;;  %v1047_v22 = vpack.c.bf16 %v1043_v12, %v1039_v29 }
 0x293   : > { %v1031_v62 = vsel %vm567_vm2, %v2068_v9, %v1029_v37  ;;  %v1037_v55 = vsel %vm567_vm2, %v1029_v37, %v2074_v41  ;;  %v996_v24 = vsel %vm514_vm3, %v983_v40, %v2076_v45  ;;  %v998_v9 = vsel %vm514_vm3, %v2080_v52, %v983_v40 }
 0x294   : > { %v1044_v13 = vmul.f32 %v1031_v62, %v1647_v19  ;;  %v1045_v2 = vmul.f32 %v1037_v55, %v1650_v20  ;;  %1139 = vmatprep.subr.bf16.mxu0 %v1047_v22  ;;  %v1002_v56 = vmul.f32 %v998_v9, %v1676_v49  ;;  %v1003_v4 = vmul.f32 %v996_v24, %v1667_v42 }
 0x295   : > { %1140 = vmatpush1.bf16.msra.mxu0 %v1046_v6  ;;  %v974_v37 = vpack.c.bf16 %v1924_v63, %v1912_v51  ;;  %v977_v40 = vpack.c.bf16 %v1996_v25, %v1988_v27 }
 0x296   : > { %v1048_v15 = vpack.c.bf16 %v1044_v13, %v1040_v0  ;;  %v985_v41 = vpop.permute.xlu0 %984  ;;  %v991_v14 = vpop.permute.xlu1 %990  ;;  %v1049_v17 = vpack.c.bf16 %v1045_v2, %v1041_v39 }
 0x297   : > { %v997_v19 = vsel %vm514_vm3, %v985_v41, %v2078_v47  ;;  %v999_v20 = vsel %vm514_vm3, %v2082_v53, %v985_v41  ;;  %v994_v50 = vsel %vm514_vm3, %v2076_v45, %v991_v14  ;;  %v1000_v61 = vsel %vm514_vm3, %v991_v14, %v2080_v52 }
 0x298   : > { %v1006_v48 = vmul.f32 %v999_v20, %v1676_v49  ;;  %v1007_v60 = vmul.f32 %v997_v19, %v1667_v42  ;;  %1180 = vmatprep.subr.bf16.mxu1 %v1049_v17  ;;  %v975_v45 = vpack.c.bf16 %v1990_v28, %v1982_v26  ;;  %v1004_v31 = vmul.f32 %v994_v50, %v1685_v58 }
 0x299   : > { %1181 = vmatpush1.bf16.msra.mxu1 %v1048_v15  ;;  %v1005_v52 = vmul.f32 %v1000_v61, %v1688_v59 }
 0x29a   : > { %v1010_v36 = vpack.c.bf16 %v1006_v48, %v1002_v56  ;;  %v993_v33 = vpop.permute.xlu0 %992  ;;  %v943_v34 = vpop.permute.xlu1 %942  ;;  %v1011_v29 = vpack.c.bf16 %v1007_v60, %v1003_v4 }
 0x29b   : > { %v995_v49 = vsel %vm514_vm3, %v2078_v47, %v993_v33  ;;  %v1001_v42 = vsel %vm514_vm3, %v993_v33, %v2082_v53  ;;  %v956_v47 = vsel %vm457_vm4, %v943_v34, %v2088_v1  ;;  %v958_v53 = vsel %vm457_vm4, %v2084_v54, %v943_v34 }
 0x29c   : > { %v1008_v12 = vmul.f32 %v995_v49, %v1685_v58  ;;  %v1009_v8 = vmul.f32 %v1001_v42, %v1688_v59  ;;  %1141 = vmatprep.subr.bf16.mxu0 %v1011_v29  ;;  %v963_v22 = vmul.f32 %v958_v53, %v1711_v30  ;;  %v964_v62 = vmul.f32 %v956_v47, %v1722_v38  ;;  %v2464_v29 = vld [vmem:[#allocation18_spill] sm:$0xff]  ;;  %v2465_v42 = vld [vmem:[#allocation16_spill] sm:$0xff]  ;;  %v2468_v53 = vld [vmem:[#allocation3_spill] sm:$0xff] }
 0x29d   : > { %1142 = vmatpush1.bf16.msra.mxu0 %v1010_v36  ;;  %v2463_v36 = vld [vmem:[#allocation2_spill] sm:$0xff] }
 0x29e   : > { %v1012_v35 = vpack.c.bf16 %v1008_v12, %v1004_v31  ;;  %v945_v26 = vpop.permute.xlu0 %944  ;;  %1143 = vmatprep.subr.bf16.mxu0 %v975_v45  ;;  %v951_v28 = vpop.permute.xlu1 %950  ;;  %v1013_v6 = vpack.c.bf16 %v1009_v8, %v1005_v52  ;;  %v2466_v12 = vld [vmem:[#allocation19_spill] sm:$0xff] }
 0x29f   : > { %v957_v58 = vsel %vm457_vm4, %v945_v26, %v2090_v3  ;;  %v959_v59 = vsel %vm457_vm4, %v2086_v11, %v945_v26  ;;  %v954_v39 = vsel %vm457_vm4, %v2088_v1, %v951_v28  ;;  %v960_v51 = vsel %vm457_vm4, %v951_v28, %v2084_v54  ;;  %v2469_v26 = vld [vmem:[#allocation4_spill] sm:$0xff] }
 0x2a0   : > { %v967_v55 = vmul.f32 %v959_v59, %v1711_v30  ;;  %v968_v0 = vmul.f32 %v957_v58, %v1722_v38  ;;  %1182 = vmatprep.subr.bf16.mxu1 %v1013_v6  ;;  %v962_v1 = vmul.f32 %v960_v51, %v1729_v43  ;;  %v965_v2 = vmul.f32 %v954_v39, %v1732_v44  ;;  %v2470_v51 = vld [vmem:[#allocation5_spill] sm:$0xff] }
 0x2a1   : > { %1144 = vmatpush1.bf16.msra.mxu0 %v974_v37  ;;  %1183 = vmatpush1.bf16.msra.mxu1 %v1012_v35 }
 0x2a2   : > { %v972_v63 = vpack.c.bf16 %v968_v0, %v964_v62  ;;  %v953_v27 = vpop.permute.xlu0 %952  ;;  %1184 = vmatprep.subr.bf16.mxu1 %v977_v40  ;;  %v907_v25 = vpop.permute.xlu1 %906  ;;  %v971_v13 = vpack.c.bf16 %v967_v55, %v963_v22 }
 0x2a3   : > { %v955_v30 = vsel %vm457_vm4, %v2090_v3, %v953_v27  ;;  %v961_v38 = vsel %vm457_vm4, %v953_v27, %v2086_v11  ;;  %v920_v9 = vsel %vm404_vm5, %v907_v25, %v2096_v18  ;;  %v922_v3 = vsel %vm404_vm5, %v2092_v21, %v907_v25  ;;  %v2471_v27 = vld [vmem:[#allocation6_spill] sm:$0xff] }
 0x2a4   : > { %v966_v54 = vmul.f32 %v961_v38, %v1729_v43  ;;  %v969_v24 = vmul.f32 %v955_v30, %v1732_v44  ;;  %1145 = vmatprep.subr.bf16.mxu0 %v971_v13  ;;  %v2462_v11 = vpack.c.bf16 %v1916_v57, %v1910_v46  ;;  %v927_v19 = vmul.f32 %v922_v3, %v1751_v16  ;;  %v2472_v38 = vld [vmem:[#allocation22_spill] sm:$0xff] }
 0x2a5   : > { %v928_v20 = vmul.f32 %v920_v9, %v1760_v5 }
 0x2a6   : > { %1185 = vmatpush1.bf16.msra.mxu1 %v2462_v11  ;;  %v970_v15 = vpack.c.bf16 %v966_v54, %v962_v1  ;;  %v909_v41 = vpop.permute.xlu0 %908  ;;  %v915_v14 = vpop.permute.xlu1 %914  ;;  %v973_v17 = vpack.c.bf16 %v969_v24, %v965_v2  ;;  %v2473_v2 = vld [vmem:[#allocation20_spill] sm:$0xff] }
 0x2a7   : > { %v921_v43 = vsel %vm404_vm5, %v909_v41, %v2098_v7  ;;  %v923_v44 = vsel %vm404_vm5, %v2094_v23, %v909_v41  ;;  %v918_v57 = vsel %vm404_vm5, %v2096_v18, %v915_v14  ;;  %v924_v4 = vsel %vm404_vm5, %v915_v14, %v2092_v21  ;;  %v2475_v14 = vld [vmem:[#allocation21_spill] sm:$0xff] }
 0x2a8   : > { %v931_v56 = vmul.f32 %v923_v44, %v1751_v16  ;;  %v932_v46 = vmul.f32 %v921_v43, %v1760_v5  ;;  %1146 = vmatpush1.bf16.msra.mxu0 %v970_v15  ;;  %1186 = vmatprep.subr.bf16.mxu1 %v973_v17  ;;  %v926_v18 = vmul.f32 %v924_v4, %v1767_v32  ;;  %v2474_v15 = vld [vmem:[#allocation23_spill] sm:$0xff] }
 0x2a9   : > { %v929_v33 = vmul.f32 %v918_v57, %v2463_v36  ;;  %v2476_v43 = vld [vmem:[#allocation7_spill] sm:$0xff] }
 0x2aa   : > { %v936_v48 = vpack.c.bf16 %v932_v46, %v928_v20  ;;  %1187 = vmatpush1.bf16.msra.mxu1 %v972_v63  ;;  %v917_v60 = vpop.permute.xlu0 %916  ;;  %v871_v50 = vpop.permute.xlu1 %870  ;;  %v935_v61 = vpack.c.bf16 %v931_v56, %v927_v19  ;;  %v2477_v19 = vld [vmem:[#allocation8_spill] sm:$0xff] }
 0x2ab   : > { %v919_v16 = vsel %vm404_vm5, %v2098_v7, %v917_v60  ;;  %v925_v5 = vsel %vm404_vm5, %v917_v60, %v2094_v23  ;;  %v884_v49 = vsel %vm351_vm6, %v871_v50, %v2464_v29  ;;  %v886_v7 = vsel %vm351_vm6, %v2465_v42, %v871_v50 }
 0x2ac   : > { %v930_v21 = vmul.f32 %v925_v5, %v1767_v32  ;;  %v933_v34 = vmul.f32 %v919_v16, %v2463_v36  ;;  %1147 = vmatprep.subr.bf16.mxu0 %v935_v61  ;;  %v2467_v32 = vld [vmem:[#allocation17_spill] sm:$0xff]  ;;  %v891_v35 = vmul.f32 %v886_v7, %v2468_v53  ;;  %v892_v28 = vmul.f32 %v884_v49, %v2469_v26  ;;  %v2480_v49 = vld [vmem:[#allocation24_spill] sm:$0xff]  ;;  %v2481_v7 = vld [vmem:[#allocation26_spill] sm:$0xff] }
 0x2ae   : > { %v934_v45 = vpack.c.bf16 %v930_v21, %v926_v18  ;;  %v873_v31 = vpop.permute.xlu0 %872  ;;  %v879_v23 = vpop.permute.xlu1 %878  ;;  %v937_v52 = vpack.c.bf16 %v933_v34, %v929_v33  ;;  %v2478_v18 = vld [vmem:[#allocation9_spill] sm:$0xff]  ;;  %v2479_v33 = vld [vmem:[#allocation10_spill] sm:$0xff] }
 0x2af   : > { %v885_v8 = vsel %vm351_vm6, %v873_v31, %v2466_v12  ;;  %v887_v47 = vsel %vm351_vm6, %v2467_v32, %v873_v31  ;;  %v882_v59 = vsel %vm351_vm6, %v2464_v29, %v879_v23  ;;  %v888_v37 = vsel %vm351_vm6, %v879_v23, %v2465_v42 }
 0x2b0   : > { %v895_v6 = vmul.f32 %v887_v47, %v2468_v53  ;;  %v896_v58 = vmul.f32 %v885_v8, %v2469_v26  ;;  %1148 = vmatpush1.bf16.msra.mxu0 %v934_v45  ;;  %1188 = vmatprep.subr.bf16.mxu1 %v937_v52  ;;  %v890_v63 = vmul.f32 %v888_v37, %v2470_v51  ;;  %v2482_v8 = vld [vmem:[#allocation25_spill] sm:$0xff]  ;;  %v2483_v47 = vld [vmem:[#allocation27_spill] sm:$0xff] }
 0x2b1   : > { %1189 = vmatpush1.bf16.msra.mxu1 %v936_v48  ;;  %v893_v25 = vmul.f32 %v882_v59, %v2471_v27 }
 0x2b2   : > { %v900_v40 = vpack.c.bf16 %v896_v58, %v892_v28  ;;  %v881_v22 = vpop.permute.xlu0 %880  ;;  %v835_v62 = vpop.permute.xlu1 %834  ;;  %v899_v55 = vpack.c.bf16 %v895_v6, %v891_v35  ;;  %v2484_v35 = vld [vmem:[#allocation12_spill] sm:$0xff]  ;;  %v2485_v28 = vld [vmem:[#allocation11_spill] sm:$0xff] }
 0x2b3   : > { %v883_v0 = vsel %vm351_vm6, %v2466_v12, %v881_v22  ;;  %v889_v39 = vsel %vm351_vm6, %v881_v22, %v2467_v32  ;;  %v848_v1 = vsel %vm298_vm7, %v835_v62, %v2472_v38  ;;  %v850_v54 = vsel %vm298_vm7, %v2473_v2, %v835_v62 }
 0x2b4   : > { %v894_v13 = vmul.f32 %v889_v39, %v2470_v51  ;;  %v897_v30 = vmul.f32 %v883_v0, %v2471_v27  ;;  %1149 = vmatprep.subr.bf16.mxu0 %v899_v55  ;;  %v855_v44 = vmul.f32 %v850_v54, %v2476_v43  ;;  %v856_v20 = vmul.f32 %v848_v1, %v2477_v19  ;;  %v2486_v51 = vld [vmem:[#allocation15_spill] sm:$0xff]  ;;  %v2487_v27 = vld [vmem:[#allocation13_spill] sm:$0xff] }
 0x2b6   : > { %v898_v24 = vpack.c.bf16 %v894_v13, %v890_v63  ;;  %v837_v9 = vpop.permute.xlu0 %836  ;;  %v843_v3 = vpop.permute.xlu1 %842  ;;  %v901_v11 = vpack.c.bf16 %v897_v30, %v893_v25  ;;  %v1309_v63 = vcombine.low %v2486_v51, %v2486_v51  ;;  %v2488_v13 = vld [vmem:[#allocation14_spill] sm:$0xff] }
 0x2b7   : > { %v849_v41 = vsel %vm298_vm7, %v837_v9, %v2474_v15  ;;  %v851_v17 = vsel %vm298_vm7, %v2475_v14, %v837_v9  ;;  %v846_v57 = vsel %vm298_vm7, %v2472_v38, %v843_v3  ;;  %v852_v4 = vsel %vm298_vm7, %v843_v3, %v2473_v2 }
 0x2b8   : > { %v859_v56 = vmul.f32 %v851_v17, %v2476_v43  ;;  %v860_v46 = vmul.f32 %v849_v41, %v2477_v19  ;;  %1150 = vmatpush1.bf16.msra.mxu0 %v898_v24  ;;  %1190 = vmatprep.subr.bf16.mxu1 %v901_v11  ;;  %v854_v36 = vmul.f32 %v852_v4, %v2478_v18 }
 0x2b9   : > { %1191 = vmatpush1.bf16.msra.mxu1 %v900_v40  ;;  %v857_v21 = vmul.f32 %v846_v57, %v2479_v33 }
 0x2ba   : > { %v864_v48 = vpack.c.bf16 %v860_v46, %v856_v20  ;;  %v845_v60 = vpop.permute.xlu0 %844  ;;  %v1091_v50 = vpop.permute.xlu1 %1090  ;;  %v863_v61 = vpack.c.bf16 %v859_v56, %v855_v44 }
 0x2bb   : > { %v847_v16 = vsel %vm298_vm7, %v2474_v15, %v845_v60  ;;  %v853_v5 = vsel %vm298_vm7, %v845_v60, %v2475_v14  ;;  %v1104_v42 = vsel %vm673_vm8, %v1091_v50, %v2480_v49  ;;  %v1106_v45 = vsel %vm673_vm8, %v2481_v7, %v1091_v50 }
 0x2bc   : > { %v858_v34 = vmul.f32 %v853_v5, %v2478_v18  ;;  %v861_v29 = vmul.f32 %v847_v16, %v2479_v33  ;;  %1151 = vmatprep.subr.bf16.mxu0 %v863_v61  ;;  %v1110_v26 = vmul.f32 %v2484_v35, %v1106_v45  ;;  %v1111_v6 = vmul.f32 %v2485_v28, %v1104_v42 }
 0x2be   : > { %v862_v31 = vpack.c.bf16 %v858_v34, %v854_v36  ;;  %v1093_v23 = vpop.permute.xlu0 %1092  ;;  %v1099_v52 = vpop.permute.xlu1 %1098  ;;  %v865_v12 = vpack.c.bf16 %v861_v29, %v857_v21 }
 0x2bf   : > { %v1105_v32 = vsel %vm673_vm8, %v1093_v23, %v2482_v8  ;;  %v1107_v53 = vsel %vm673_vm8, %v2483_v47, %v1093_v23  ;;  %v1102_v37 = vsel %vm673_vm8, %v2480_v49, %v1099_v52  ;;  %v1108_v40 = vsel %vm673_vm8, %v1099_v52, %v2481_v7 }
 0x2c0   : > { %v1114_v58 = vmul.f32 %v2484_v35, %v1107_v53  ;;  %v1115_v59 = vmul.f32 %v2485_v28, %v1105_v32  ;;  %1152 = vmatpush1.bf16.msra.mxu0 %v862_v31  ;;  %1192 = vmatprep.subr.bf16.mxu1 %v865_v12  ;;  %v1112_v25 = vmul.f32 %v2487_v27, %v1102_v37 }
 0x2c1   : > { %1193 = vmatpush1.bf16.msra.mxu1 %v864_v48  ;;  %v1113_v30 = vmul.f32 %v2488_v13, %v1108_v40 }
 0x2c2   : > { %v1118_v22 = vpack.c.bf16 %v1114_v58, %v1110_v26  ;;  %v1101_v62 = vpop.permute.xlu0 %1100  ;;  %v1119_v55 = vpack.c.bf16 %v1115_v59, %v1111_v6 }
 0x2c3   : > { %v1103_v0 = vsel %vm673_vm8, %v2482_v8, %v1101_v62  ;;  %v1109_v39 = vsel %vm673_vm8, %v1101_v62, %v2483_v47 }
 0x2c4   : > { %v1116_v38 = vmul.f32 %v2487_v27, %v1103_v0  ;;  %v1117_v1 = vmul.f32 %v2488_v13, %v1109_v39  ;;  %1167 = vmatprep.subr.bf16.mxu0 %v1119_v55 }
 0x2c5   : > { %1168 = vmatpush2.bf16.msra.mxu0 %v1118_v22 }
 0x2c6   : > { %v1120_v2 = vpack.c.bf16 %v1116_v38, %v1112_v25  ;;  %v1121_v54 = vpack.c.bf16 %v1117_v1, %v1113_v30 }
 0x2c8   : > { %1170 = vmatmul.mubr.bf16.vlgmr.msra.gmra.mxu0 %v1309_v63  ;;  %1208 = vmatprep.subr.bf16.mxu1 %v1121_v54 }
 0x2c9   : > { %1209 = vmatpush2.bf16.msra.mxu1 %v1120_v2 }
 0x2cb   : > { %v1126_v10 = vpop.permute.xlu1 %1125 }
 0x2cc   : > { %1211 = vmatmul.mubr.bf16.vlgmr.msra.gmra.mxu1 %v1309_v63 }
 0x388   : > { %v1171_v24 = vpop.f32.mrf.mxu0 }
 0x389   : > { %v1172_v9 = vadd.f32 %v1171_v24, %v1126_v10 }
 0x38a   : > { %v1173_v3 = vpop.f32.mrf.mxu0 }
 0x38b   : > { %v1219_v11 = vmax.f32 %v1172_v9, 0.0  ;;  %v1174_v15 = vadd.f32 %v1173_v3, %v1126_v10 }
 0x38c   : > { %v1175_v41 = vpop.f32.mrf.mxu0  ;;  %v1212_v14 = vpop.f32.mrf.mxu1 }
 0x38d   : > { %1223 = vst [vmem:[%s258_s11] sm:$0xff] %v1219_v11  ;;  %v1220_v17 = vmax.f32 %v1174_v15, 0.0  ;;  %v1213_v43 = vadd.f32 %v1212_v14, %v1126_v10 }
 0x38e   : > { %v1176_v44 = vpop.f32.mrf.mxu0  ;;  %v1214_v19 = vpop.f32.mrf.mxu1 }
 0x38f   : > { %1224 = vst [vmem:[%s258_s11 + $0x8] sm:$0xff] %v1220_v17  ;;  %v1221_v20 = vmax.f32 %v1213_v43, 0.0  ;;  %v1215_v56 = vadd.f32 %v1214_v19, %v1126_v10 }
 0x390   : > { %v1216_v46 = vpop.f32.mrf.mxu1 }
 0x391   : > { %1313 = vst [vmem:[%s258_s11 + $0x10] sm:$0xff] %v1221_v20  ;;  %v1222_v57 = vmax.f32 %v1215_v56, 0.0 }
 0x392   : > { %v1217_v4 = vpop.f32.mrf.mxu1 }
 0x393   : > { %1314 = vst [vmem:[%s258_s11 + $0x18] sm:$0xff] %v1222_v57 }
 0x394 PF: > { %s16_s21 = sadd.s32 1, %s1349_s21  }
 0x395   : > { %p13_p4 = scmp.ge.s32.totalorder %s16_s21, 4  }
 0x397   :  { %15 = sbr.rel (!%p13_p4) target bundleno = 1 (0x1), region = 76 }

</bundles_post_ra>
